<compile_context>
chip_gen: v7x
topology: tpu7x:2x2x1
jax: 0.10.0
libtpu: 0.0.40
codegen_flags: <defaults>
</compile_context>

<pallas_src>
import jax
import jax.numpy as jnp
from jax.experimental import pallas as pl
from jax.experimental.pallas import tpu as pltpu

EPS = 1e-5


def conv3x3_forward(x, weight, gamma, beta, *, stride=1, padding=1,
                    bn_tile_rows=512, use_bf16_matmul=False):
    """ReLU -> Conv3d(k=3, bias=False) -> BatchNorm3d (train mode).

    x: (N, C_in, D, H, W) f32; weight: (C_out, C_in, 3, 3, 3) f32;
    gamma/beta: (C_out,) f32.  Returns (N, C_out, Do, Ho, Wo) f32.
    """
    N, C_in, D, H, W = x.shape
    C_out = weight.shape[0]
    K = 3
    s, p = stride, padding
    Do = (D + 2 * p - K) // s + 1
    Ho = (H + 2 * p - K) // s + 1
    Wo = (W + 2 * p - K) // s + 1
    Dp, Hp, Wp = D + 2 * p, H + 2 * p, W + 2 * p
    M = N * Do * Ho * Wo

    compute_dtype = jnp.bfloat16 if use_bf16_matmul else jnp.float32

    # ---- glue: NCDHW -> NDHWC (channels on lanes) + zero pad spatial dims ----
    x_ndhwc = jnp.transpose(x, (0, 2, 3, 4, 1))
    xp = jnp.pad(x_ndhwc, ((0, 0), (p, p), (p, p), (p, p), (0, 0)))

    # torch weight (C_out, C_in, kd, kh, kw) -> (kd, kh, kw, C_in, C_out)
    wmat = jnp.transpose(weight, (2, 3, 4, 1, 0)).astype(compute_dtype)

    # ---- Pallas kernel 1: ReLU + conv (27 tap matmuls) + BN partial stats ----
    def conv_kernel(w_ref, x0_ref, x1_ref, x2_ref, y_ref, st_ref):
        w_all = w_ref[...]                                     # (3,3,3,C_in,C_out)
        acc = jnp.zeros((Ho * Wo, C_out), jnp.float32)
        x_refs = (x0_ref, x1_ref, x2_ref)
        for kd in range(K):
            # ReLU once per loaded slice (zero padding stays zero, identical
            # to ReLU-before-pad), then optional bf16 cast for the MXU.
            xb = jnp.maximum(x_refs[kd][0, 0], 0.0)            # (Hp, Wp, C_in) f32
            xb = xb.astype(compute_dtype)
            for kh in range(K):
                for kw in range(K):
                    tap = jax.lax.slice(
                        xb, (kh, kw, 0),
                        (kh + (Ho - 1) * s + 1, kw + (Wo - 1) * s + 1, C_in),
                        (s, s, 1))                             # (Ho, Wo, C_in)
                    tap = tap.reshape(Ho * Wo, C_in)
                    acc = acc + jnp.dot(tap, w_all[kd, kh, kw],
                                        preferred_element_type=jnp.float32)
        y_ref[0, 0] = acc.astype(y_ref.dtype)
        # Fused BatchNorm partial statistics for this output slab.
        ssum = jnp.sum(acc, axis=0, keepdims=True)             # (1, C_out)
        ssq = jnp.sum(acc * acc, axis=0, keepdims=True)        # (1, C_out)
        st_ref[0, 0] = jnp.concatenate([ssum, ssq], axis=0)    # (2, C_out)

    def x_spec(kd):
        # Padded depth slice do*s + kd (block size 1 along depth => the block
        # index IS the element index), streamed & double-buffered by Pallas.
        return pl.BlockSpec(
            (1, 1, Hp, Wp, C_in),
            lambda n, do, kd=kd: (n, do * s + kd, 0, 0, 0))

    conv_out, stats = pl.pallas_call(
        conv_kernel,
        out_shape=(
            jax.ShapeDtypeStruct((N, Do, Ho * Wo, C_out), jnp.float32),
            jax.ShapeDtypeStruct((N, Do, 2, C_out), jnp.float32),
        ),
        grid=(N, Do),
        in_specs=[
            pl.BlockSpec((K, K, K, C_in, C_out), lambda n, do: (0, 0, 0, 0, 0)),
            x_spec(0), x_spec(1), x_spec(2),
        ],
        out_specs=(
            pl.BlockSpec((1, 1, Ho * Wo, C_out), lambda n, do: (n, do, 0, 0)),
            pl.BlockSpec((1, 1, 2, C_out), lambda n, do: (n, do, 0, 0)),
        ),
        compiler_params=pltpu.CompilerParams(
            dimension_semantics=("parallel", "parallel"),
            vmem_limit_bytes=48 * 1024 * 1024),   # fits v7x 64 MiB physical VMEM
    )(wmat, xp, xp, xp)

    # ---- tiny glue: fold partial stats into per-channel scale / shift ----
    tot = jnp.sum(stats, axis=(0, 1))                          # (2, C_out)
    mean = tot[0] / M
    var = jnp.maximum(tot[1] / M - mean * mean, 0.0)           # biased variance
    inv = jax.lax.rsqrt(var + EPS)
    g32 = gamma.astype(jnp.float32)
    b32 = beta.astype(jnp.float32)
    scale = (g32 * inv).reshape(1, C_out)
    shift = (b32 - mean * g32 * inv).reshape(1, C_out)

    # ---- Pallas kernel 2: tiled element-wise normalize (in-place over conv) ----
    def bn_kernel(y_ref, sc_ref, sh_ref, o_ref):
        o_ref[...] = y_ref[...] * sc_ref[...] + sh_ref[...]

    y_flat = conv_out.reshape(M, C_out)
    tile_m = min(bn_tile_rows, M)
    if tile_m != M:
        tile_m = max(8, (tile_m // 8) * 8)
    y_bn = pl.pallas_call(
        bn_kernel,
        out_shape=jax.ShapeDtypeStruct((M, C_out), jnp.float32),
        grid=(pl.cdiv(M, tile_m),),
        in_specs=[
            pl.BlockSpec((tile_m, C_out), lambda i: (i, 0)),
            pl.BlockSpec((1, C_out), lambda i: (0, 0)),
            pl.BlockSpec((1, C_out), lambda i: (0, 0)),
        ],
        out_specs=pl.BlockSpec((tile_m, C_out), lambda i: (i, 0)),
        input_output_aliases={0: 0},          # normalize in place over conv_out
        compiler_params=pltpu.CompilerParams(
            dimension_semantics=("parallel",)),
    )(y_flat, scale, shift)

    # ---- glue: back to NCDHW ----
    y5 = y_bn.reshape(N, Do, Ho, Wo, C_out)
    return jnp.transpose(y5, (0, 4, 1, 2, 3))


def _reference(x, weight, gamma, beta, stride, padding):
    """Pure-JAX reference: BatchNorm3d(Conv3d(ReLU(x))) in train mode."""
    xr = jnp.maximum(x, 0.0)
    y = jax.lax.conv_general_dilated(
        xr, weight, window_strides=(stride,) * 3,
        padding=[(padding, padding)] * 3,
        dimension_numbers=("NCDHW", "OIDHW", "NCDHW"),
        precision=jax.lax.Precision.HIGHEST)
    mean = jnp.mean(y, axis=(0, 2, 3, 4), keepdims=True)
    var = jnp.mean(jnp.square(y - mean), axis=(0, 2, 3, 4), keepdims=True)
    yn = (y - mean) * jax.lax.rsqrt(var + EPS)
    return yn * gamma.reshape(1, -1, 1, 1, 1) + beta.reshape(1, -1, 1, 1, 1)


if __name__ == "__main__":
    key = jax.random.PRNGKey(0)
    kx, kw = jax.random.split(key)

    # Small shapes consistent with Conv3x3(C_in=4, C_out=8, stride=1, padding=1)
    N, C_in, C_out, D, H, W = 2, 4, 8, 8, 8, 8
    x = jax.random.normal(kx, (N, C_in, D, H, W), dtype=jnp.float32)
    weight = 0.1 * jax.random.normal(kw, (C_out, C_in, 3, 3, 3), dtype=jnp.float32)
    gamma = jnp.ones((C_out,), jnp.float32)   # BatchNorm3d affine init
    beta = jnp.zeros((C_out,), jnp.float32)

    out = conv3x3_forward(x, weight, gamma, beta, stride=1, padding=1)
    out = jax.block_until_ready(out)

    assert out.shape == (N, C_out, D, H, W), out.shape
    assert bool(jnp.all(jnp.isfinite(out)))

    ref = _reference(x, weight, gamma, beta, 1, 1)
    assert bool(jnp.allclose(out, ref, atol=5e-3, rtol=5e-3)), (
        float(jnp.max(jnp.abs(out - ref))))

    print("KERNEL_OK")
</pallas_src>

<mosaic_0001>
module attributes {stable_mosaic.version = 11 : i64} {
  func.func @conv_kernel(%arg0: i32, %arg1: i32, %arg2: memref<3x3x3x4x8xf32, #tpu.memory_space<vmem>>, %arg3: memref<1x1x10x10x4xf32, #tpu.memory_space<vmem>>, %arg4: memref<1x1x10x10x4xf32, #tpu.memory_space<vmem>>, %arg5: memref<1x1x10x10x4xf32, #tpu.memory_space<vmem>>, %arg6: memref<1x1x64x8xf32, #tpu.memory_space<vmem>>, %arg7: memref<1x1x2x8xf32, #tpu.memory_space<vmem>>) attributes {dimension_semantics = [#tpu.dimension_semantics<parallel>, #tpu.dimension_semantics<parallel>], iteration_bounds = array<i64: 2, 8>, scalar_prefetch = 0 : i64, scratch_operands = 0 : i64, tpu.core_type = #tpu.core_type<tc>, window_params = [{pipeline_mode = #tpu.pipeline_mode<synchronous>, transform_indices = @transform_0, window_bounds = array<i64: 3, 3, 3, 4, 8>}, {transform_indices = @transform_1, window_bounds = array<i64: 1, 1, 10, 10, 4>}, {transform_indices = @transform_2, window_bounds = array<i64: 1, 1, 10, 10, 4>}, {transform_indices = @transform_3, window_bounds = array<i64: 1, 1, 10, 10, 4>}, {transform_indices = @transform_4, window_bounds = array<i64: 1, 1, 64, 8>}, {transform_indices = @transform_5, window_bounds = array<i64: 1, 1, 2, 8>}]} {
    %c0 = arith.constant 0 : index
    %c0_0 = arith.constant 0 : index
    %c0_1 = arith.constant 0 : index
    %c0_2 = arith.constant 0 : index
    %c0_3 = arith.constant 0 : index
    %0 = vector.load %arg2[%c0, %c0_0, %c0_1, %c0_2, %c0_3] : memref<3x3x3x4x8xf32, #tpu.memory_space<vmem>>, vector<3x3x3x4x8xf32>
    %cst = arith.constant 0.000000e+00 : f32
    %1 = vector.broadcast %cst : f32 to vector<64x8xf32>
    %c0_4 = arith.constant 0 : index
    %c0_5 = arith.constant 0 : index
    %c0_6 = arith.constant 0 : index
    %c0_7 = arith.constant 0 : index
    %c0_8 = arith.constant 0 : index
    %2 = vector.load %arg3[%c0_4, %c0_5, %c0_6, %c0_7, %c0_8] : memref<1x1x10x10x4xf32, #tpu.memory_space<vmem>>, vector<1x1x10x10x4xf32>
    %3 = vector.shape_cast %2 : vector<1x1x10x10x4xf32> to vector<10x10x4xf32>
    %cst_9 = arith.constant 0.000000e+00 : f32
    %4 = vector.broadcast %cst_9 : f32 to vector<10x10x4xf32>
    %5 = arith.maximumf %3, %4 : vector<10x10x4xf32>
    %6 = vector.extract_strided_slice %5 {offsets = [0, 0, 0], sizes = [8, 8, 4], strides = [1, 1, 1]} : vector<10x10x4xf32> to vector<8x8x4xf32>
    %7 = vector.shape_cast %6 : vector<8x8x4xf32> to vector<64x4xf32>
    %8 = vector.extract_strided_slice %0 {offsets = [0, 0, 0, 0, 0], sizes = [1, 1, 1, 4, 8], strides = [1, 1, 1, 1, 1]} : vector<3x3x3x4x8xf32> to vector<1x1x1x4x8xf32>
    %9 = vector.shape_cast %8 : vector<1x1x1x4x8xf32> to vector<4x8xf32>
    %cst_10 = arith.constant dense<0.000000e+00> : vector<64x8xf32>
    %10 = tpu.matmul %7, %9, %cst_10 {dimension_numbers = #tpu.dot_dimension_numbers<[1], [0], [0], [1], [0, 0, 1, 1], [], []>} : vector<64x4xf32>, vector<4x8xf32>, vector<64x8xf32> -> vector<64x8xf32>
    %11 = arith.addf %1, %10 : vector<64x8xf32>
    %12 = vector.extract_strided_slice %5 {offsets = [0, 1, 0], sizes = [8, 8, 4], strides = [1, 1, 1]} : vector<10x10x4xf32> to vector<8x8x4xf32>
    %13 = vector.shape_cast %12 : vector<8x8x4xf32> to vector<64x4xf32>
    %14 = vector.extract_strided_slice %0 {offsets = [0, 0, 1, 0, 0], sizes = [1, 1, 1, 4, 8], strides = [1, 1, 1, 1, 1]} : vector<3x3x3x4x8xf32> to vector<1x1x1x4x8xf32>
    %15 = vector.shape_cast %14 : vector<1x1x1x4x8xf32> to vector<4x8xf32>
    %cst_11 = arith.constant dense<0.000000e+00> : vector<64x8xf32>
    %16 = tpu.matmul %13, %15, %cst_11 {dimension_numbers = #tpu.dot_dimension_numbers<[1], [0], [0], [1], [0, 0, 1, 1], [], []>} : vector<64x4xf32>, vector<4x8xf32>, vector<64x8xf32> -> vector<64x8xf32>
    %17 = arith.addf %11, %16 : vector<64x8xf32>
    %18 = vector.extract_strided_slice %5 {offsets = [0, 2, 0], sizes = [8, 8, 4], strides = [1, 1, 1]} : vector<10x10x4xf32> to vector<8x8x4xf32>
    %19 = vector.shape_cast %18 : vector<8x8x4xf32> to vector<64x4xf32>
    %20 = vector.extract_strided_slice %0 {offsets = [0, 0, 2, 0, 0], sizes = [1, 1, 1, 4, 8], strides = [1, 1, 1, 1, 1]} : vector<3x3x3x4x8xf32> to vector<1x1x1x4x8xf32>
    %21 = vector.shape_cast %20 : vector<1x1x1x4x8xf32> to vector<4x8xf32>
    %cst_12 = arith.constant dense<0.000000e+00> : vector<64x8xf32>
    %22 = tpu.matmul %19, %21, %cst_12 {dimension_numbers = #tpu.dot_dimension_numbers<[1], [0], [0], [1], [0, 0, 1, 1], [], []>} : vector<64x4xf32>, vector<4x8xf32>, vector<64x8xf32> -> vector<64x8xf32>
    %23 = arith.addf %17, %22 : vector<64x8xf32>
    %24 = vector.extract_strided_slice %5 {offsets = [1, 0, 0], sizes = [8, 8, 4], strides = [1, 1, 1]} : vector<10x10x4xf32> to vector<8x8x4xf32>
    %25 = vector.shape_cast %24 : vector<8x8x4xf32> to vector<64x4xf32>
    %26 = vector.extract_strided_slice %0 {offsets = [0, 1, 0, 0, 0], sizes = [1, 1, 1, 4, 8], strides = [1, 1, 1, 1, 1]} : vector<3x3x3x4x8xf32> to vector<1x1x1x4x8xf32>
    %27 = vector.shape_cast %26 : vector<1x1x1x4x8xf32> to vector<4x8xf32>
    %cst_13 = arith.constant dense<0.000000e+00> : vector<64x8xf32>
    %28 = tpu.matmul %25, %27, %cst_13 {dimension_numbers = #tpu.dot_dimension_numbers<[1], [0], [0], [1], [0, 0, 1, 1], [], []>} : vector<64x4xf32>, vector<4x8xf32>, vector<64x8xf32> -> vector<64x8xf32>
    %29 = arith.addf %23, %28 : vector<64x8xf32>
    %30 = vector.extract_strided_slice %5 {offsets = [1, 1, 0], sizes = [8, 8, 4], strides = [1, 1, 1]} : vector<10x10x4xf32> to vector<8x8x4xf32>
    %31 = vector.shape_cast %30 : vector<8x8x4xf32> to vector<64x4xf32>
    %32 = vector.extract_strided_slice %0 {offsets = [0, 1, 1, 0, 0], sizes = [1, 1, 1, 4, 8], strides = [1, 1, 1, 1, 1]} : vector<3x3x3x4x8xf32> to vector<1x1x1x4x8xf32>
    %33 = vector.shape_cast %32 : vector<1x1x1x4x8xf32> to vector<4x8xf32>
    %cst_14 = arith.constant dense<0.000000e+00> : vector<64x8xf32>
    %34 = tpu.matmul %31, %33, %cst_14 {dimension_numbers = #tpu.dot_dimension_numbers<[1], [0], [0], [1], [0, 0, 1, 1], [], []>} : vector<64x4xf32>, vector<4x8xf32>, vector<64x8xf32> -> vector<64x8xf32>
    %35 = arith.addf %29, %34 : vector<64x8xf32>
    %36 = vector.extract_strided_slice %5 {offsets = [1, 2, 0], sizes = [8, 8, 4], strides = [1, 1, 1]} : vector<10x10x4xf32> to vector<8x8x4xf32>
    %37 = vector.shape_cast %36 : vector<8x8x4xf32> to vector<64x4xf32>
    %38 = vector.extract_strided_slice %0 {offsets = [0, 1, 2, 0, 0], sizes = [1, 1, 1, 4, 8], strides = [1, 1, 1, 1, 1]} : vector<3x3x3x4x8xf32> to vector<1x1x1x4x8xf32>
    %39 = vector.shape_cast %38 : vector<1x1x1x4x8xf32> to vector<4x8xf32>
    %cst_15 = arith.constant dense<0.000000e+00> : vector<64x8xf32>
    %40 = tpu.matmul %37, %39, %cst_15 {dimension_numbers = #tpu.dot_dimension_numbers<[1], [0], [0], [1], [0, 0, 1, 1], [], []>} : vector<64x4xf32>, vector<4x8xf32>, vector<64x8xf32> -> vector<64x8xf32>
    %41 = arith.addf %35, %40 : vector<64x8xf32>
    %42 = vector.extract_strided_slice %5 {offsets = [2, 0, 0], sizes = [8, 8, 4], strides = [1, 1, 1]} : vector<10x10x4xf32> to vector<8x8x4xf32>
    %43 = vector.shape_cast %42 : vector<8x8x4xf32> to vector<64x4xf32>
    %44 = vector.extract_strided_slice %0 {offsets = [0, 2, 0, 0, 0], sizes = [1, 1, 1, 4, 8], strides = [1, 1, 1, 1, 1]} : vector<3x3x3x4x8xf32> to vector<1x1x1x4x8xf32>
    %45 = vector.shape_cast %44 : vector<1x1x1x4x8xf32> to vector<4x8xf32>
    %cst_16 = arith.constant dense<0.000000e+00> : vector<64x8xf32>
    %46 = tpu.matmul %43, %45, %cst_16 {dimension_numbers = #tpu.dot_dimension_numbers<[1], [0], [0], [1], [0, 0, 1, 1], [], []>} : vector<64x4xf32>, vector<4x8xf32>, vector<64x8xf32> -> vector<64x8xf32>
    %47 = arith.addf %41, %46 : vector<64x8xf32>
    %48 = vector.extract_strided_slice %5 {offsets = [2, 1, 0], sizes = [8, 8, 4], strides = [1, 1, 1]} : vector<10x10x4xf32> to vector<8x8x4xf32>
    %49 = vector.shape_cast %48 : vector<8x8x4xf32> to vector<64x4xf32>
    %50 = vector.extract_strided_slice %0 {offsets = [0, 2, 1, 0, 0], sizes = [1, 1, 1, 4, 8], strides = [1, 1, 1, 1, 1]} : vector<3x3x3x4x8xf32> to vector<1x1x1x4x8xf32>
    %51 = vector.shape_cast %50 : vector<1x1x1x4x8xf32> to vector<4x8xf32>
    %cst_17 = arith.constant dense<0.000000e+00> : vector<64x8xf32>
    %52 = tpu.matmul %49, %51, %cst_17 {dimension_numbers = #tpu.dot_dimension_numbers<[1], [0], [0], [1], [0, 0, 1, 1], [], []>} : vector<64x4xf32>, vector<4x8xf32>, vector<64x8xf32> -> vector<64x8xf32>
    %53 = arith.addf %47, %52 : vector<64x8xf32>
    %54 = vector.extract_strided_slice %5 {offsets = [2, 2, 0], sizes = [8, 8, 4], strides = [1, 1, 1]} : vector<10x10x4xf32> to vector<8x8x4xf32>
    %55 = vector.shape_cast %54 : vector<8x8x4xf32> to vector<64x4xf32>
    %56 = vector.extract_strided_slice %0 {offsets = [0, 2, 2, 0, 0], sizes = [1, 1, 1, 4, 8], strides = [1, 1, 1, 1, 1]} : vector<3x3x3x4x8xf32> to vector<1x1x1x4x8xf32>
    %57 = vector.shape_cast %56 : vector<1x1x1x4x8xf32> to vector<4x8xf32>
    %cst_18 = arith.constant dense<0.000000e+00> : vector<64x8xf32>
    %58 = tpu.matmul %55, %57, %cst_18 {dimension_numbers = #tpu.dot_dimension_numbers<[1], [0], [0], [1], [0, 0, 1, 1], [], []>} : vector<64x4xf32>, vector<4x8xf32>, vector<64x8xf32> -> vector<64x8xf32>
    %59 = arith.addf %53, %58 : vector<64x8xf32>
    %c0_19 = arith.constant 0 : index
    %c0_20 = arith.constant 0 : index
    %c0_21 = arith.constant 0 : index
    %c0_22 = arith.constant 0 : index
    %c0_23 = arith.constant 0 : index
    %60 = vector.load %arg4[%c0_19, %c0_20, %c0_21, %c0_22, %c0_23] : memref<1x1x10x10x4xf32, #tpu.memory_space<vmem>>, vector<1x1x10x10x4xf32>
    %61 = vector.shape_cast %60 : vector<1x1x10x10x4xf32> to vector<10x10x4xf32>
    %cst_24 = arith.constant 0.000000e+00 : f32
    %62 = vector.broadcast %cst_24 : f32 to vector<10x10x4xf32>
    %63 = arith.maximumf %61, %62 : vector<10x10x4xf32>
    %64 = vector.extract_strided_slice %63 {offsets = [0, 0, 0], sizes = [8, 8, 4], strides = [1, 1, 1]} : vector<10x10x4xf32> to vector<8x8x4xf32>
    %65 = vector.shape_cast %64 : vector<8x8x4xf32> to vector<64x4xf32>
    %66 = vector.extract_strided_slice %0 {offsets = [1, 0, 0, 0, 0], sizes = [1, 1, 1, 4, 8], strides = [1, 1, 1, 1, 1]} : vector<3x3x3x4x8xf32> to vector<1x1x1x4x8xf32>
    %67 = vector.shape_cast %66 : vector<1x1x1x4x8xf32> to vector<4x8xf32>
    %cst_25 = arith.constant dense<0.000000e+00> : vector<64x8xf32>
    %68 = tpu.matmul %65, %67, %cst_25 {dimension_numbers = #tpu.dot_dimension_numbers<[1], [0], [0], [1], [0, 0, 1, 1], [], []>} : vector<64x4xf32>, vector<4x8xf32>, vector<64x8xf32> -> vector<64x8xf32>
    %69 = arith.addf %59, %68 : vector<64x8xf32>
    %70 = vector.extract_strided_slice %63 {offsets = [0, 1, 0], sizes = [8, 8, 4], strides = [1, 1, 1]} : vector<10x10x4xf32> to vector<8x8x4xf32>
    %71 = vector.shape_cast %70 : vector<8x8x4xf32> to vector<64x4xf32>
    %72 = vector.extract_strided_slice %0 {offsets = [1, 0, 1, 0, 0], sizes = [1, 1, 1, 4, 8], strides = [1, 1, 1, 1, 1]} : vector<3x3x3x4x8xf32> to vector<1x1x1x4x8xf32>
    %73 = vector.shape_cast %72 : vector<1x1x1x4x8xf32> to vector<4x8xf32>
    %cst_26 = arith.constant dense<0.000000e+00> : vector<64x8xf32>
    %74 = tpu.matmul %71, %73, %cst_26 {dimension_numbers = #tpu.dot_dimension_numbers<[1], [0], [0], [1], [0, 0, 1, 1], [], []>} : vector<64x4xf32>, vector<4x8xf32>, vector<64x8xf32> -> vector<64x8xf32>
    %75 = arith.addf %69, %74 : vector<64x8xf32>
    %76 = vector.extract_strided_slice %63 {offsets = [0, 2, 0], sizes = [8, 8, 4], strides = [1, 1, 1]} : vector<10x10x4xf32> to vector<8x8x4xf32>
    %77 = vector.shape_cast %76 : vector<8x8x4xf32> to vector<64x4xf32>
    %78 = vector.extract_strided_slice %0 {offsets = [1, 0, 2, 0, 0], sizes = [1, 1, 1, 4, 8], strides = [1, 1, 1, 1, 1]} : vector<3x3x3x4x8xf32> to vector<1x1x1x4x8xf32>
    %79 = vector.shape_cast %78 : vector<1x1x1x4x8xf32> to vector<4x8xf32>
    %cst_27 = arith.constant dense<0.000000e+00> : vector<64x8xf32>
    %80 = tpu.matmul %77, %79, %cst_27 {dimension_numbers = #tpu.dot_dimension_numbers<[1], [0], [0], [1], [0, 0, 1, 1], [], []>} : vector<64x4xf32>, vector<4x8xf32>, vector<64x8xf32> -> vector<64x8xf32>
    %81 = arith.addf %75, %80 : vector<64x8xf32>
    %82 = vector.extract_strided_slice %63 {offsets = [1, 0, 0], sizes = [8, 8, 4], strides = [1, 1, 1]} : vector<10x10x4xf32> to vector<8x8x4xf32>
    %83 = vector.shape_cast %82 : vector<8x8x4xf32> to vector<64x4xf32>
    %84 = vector.extract_strided_slice %0 {offsets = [1, 1, 0, 0, 0], sizes = [1, 1, 1, 4, 8], strides = [1, 1, 1, 1, 1]} : vector<3x3x3x4x8xf32> to vector<1x1x1x4x8xf32>
    %85 = vector.shape_cast %84 : vector<1x1x1x4x8xf32> to vector<4x8xf32>
    %cst_28 = arith.constant dense<0.000000e+00> : vector<64x8xf32>
    %86 = tpu.matmul %83, %85, %cst_28 {dimension_numbers = #tpu.dot_dimension_numbers<[1], [0], [0], [1], [0, 0, 1, 1], [], []>} : vector<64x4xf32>, vector<4x8xf32>, vector<64x8xf32> -> vector<64x8xf32>
    %87 = arith.addf %81, %86 : vector<64x8xf32>
    %88 = vector.extract_strided_slice %63 {offsets = [1, 1, 0], sizes = [8, 8, 4], strides = [1, 1, 1]} : vector<10x10x4xf32> to vector<8x8x4xf32>
    %89 = vector.shape_cast %88 : vector<8x8x4xf32> to vector<64x4xf32>
    %90 = vector.extract_strided_slice %0 {offsets = [1, 1, 1, 0, 0], sizes = [1, 1, 1, 4, 8], strides = [1, 1, 1, 1, 1]} : vector<3x3x3x4x8xf32> to vector<1x1x1x4x8xf32>
    %91 = vector.shape_cast %90 : vector<1x1x1x4x8xf32> to vector<4x8xf32>
    %cst_29 = arith.constant dense<0.000000e+00> : vector<64x8xf32>
    %92 = tpu.matmul %89, %91, %cst_29 {dimension_numbers = #tpu.dot_dimension_numbers<[1], [0], [0], [1], [0, 0, 1, 1], [], []>} : vector<64x4xf32>, vector<4x8xf32>, vector<64x8xf32> -> vector<64x8xf32>
    %93 = arith.addf %87, %92 : vector<64x8xf32>
    %94 = vector.extract_strided_slice %63 {offsets = [1, 2, 0], sizes = [8, 8, 4], strides = [1, 1, 1]} : vector<10x10x4xf32> to vector<8x8x4xf32>
    %95 = vector.shape_cast %94 : vector<8x8x4xf32> to vector<64x4xf32>
    %96 = vector.extract_strided_slice %0 {offsets = [1, 1, 2, 0, 0], sizes = [1, 1, 1, 4, 8], strides = [1, 1, 1, 1, 1]} : vector<3x3x3x4x8xf32> to vector<1x1x1x4x8xf32>
    %97 = vector.shape_cast %96 : vector<1x1x1x4x8xf32> to vector<4x8xf32>
    %cst_30 = arith.constant dense<0.000000e+00> : vector<64x8xf32>
    %98 = tpu.matmul %95, %97, %cst_30 {dimension_numbers = #tpu.dot_dimension_numbers<[1], [0], [0], [1], [0, 0, 1, 1], [], []>} : vector<64x4xf32>, vector<4x8xf32>, vector<64x8xf32> -> vector<64x8xf32>
    %99 = arith.addf %93, %98 : vector<64x8xf32>
    %100 = vector.extract_strided_slice %63 {offsets = [2, 0, 0], sizes = [8, 8, 4], strides = [1, 1, 1]} : vector<10x10x4xf32> to vector<8x8x4xf32>
    %101 = vector.shape_cast %100 : vector<8x8x4xf32> to vector<64x4xf32>
    %102 = vector.extract_strided_slice %0 {offsets = [1, 2, 0, 0, 0], sizes = [1, 1, 1, 4, 8], strides = [1, 1, 1, 1, 1]} : vector<3x3x3x4x8xf32> to vector<1x1x1x4x8xf32>
    %103 = vector.shape_cast %102 : vector<1x1x1x4x8xf32> to vector<4x8xf32>
    %cst_31 = arith.constant dense<0.000000e+00> : vector<64x8xf32>
    %104 = tpu.matmul %101, %103, %cst_31 {dimension_numbers = #tpu.dot_dimension_numbers<[1], [0], [0], [1], [0, 0, 1, 1], [], []>} : vector<64x4xf32>, vector<4x8xf32>, vector<64x8xf32> -> vector<64x8xf32>
    %105 = arith.addf %99, %104 : vector<64x8xf32>
    %106 = vector.extract_strided_slice %63 {offsets = [2, 1, 0], sizes = [8, 8, 4], strides = [1, 1, 1]} : vector<10x10x4xf32> to vector<8x8x4xf32>
    %107 = vector.shape_cast %106 : vector<8x8x4xf32> to vector<64x4xf32>
    %108 = vector.extract_strided_slice %0 {offsets = [1, 2, 1, 0, 0], sizes = [1, 1, 1, 4, 8], strides = [1, 1, 1, 1, 1]} : vector<3x3x3x4x8xf32> to vector<1x1x1x4x8xf32>
    %109 = vector.shape_cast %108 : vector<1x1x1x4x8xf32> to vector<4x8xf32>
    %cst_32 = arith.constant dense<0.000000e+00> : vector<64x8xf32>
    %110 = tpu.matmul %107, %109, %cst_32 {dimension_numbers = #tpu.dot_dimension_numbers<[1], [0], [0], [1], [0, 0, 1, 1], [], []>} : vector<64x4xf32>, vector<4x8xf32>, vector<64x8xf32> -> vector<64x8xf32>
    %111 = arith.addf %105, %110 : vector<64x8xf32>
    %112 = vector.extract_strided_slice %63 {offsets = [2, 2, 0], sizes = [8, 8, 4], strides = [1, 1, 1]} : vector<10x10x4xf32> to vector<8x8x4xf32>
    %113 = vector.shape_cast %112 : vector<8x8x4xf32> to vector<64x4xf32>
    %114 = vector.extract_strided_slice %0 {offsets = [1, 2, 2, 0, 0], sizes = [1, 1, 1, 4, 8], strides = [1, 1, 1, 1, 1]} : vector<3x3x3x4x8xf32> to vector<1x1x1x4x8xf32>
    %115 = vector.shape_cast %114 : vector<1x1x1x4x8xf32> to vector<4x8xf32>
    %cst_33 = arith.constant dense<0.000000e+00> : vector<64x8xf32>
    %116 = tpu.matmul %113, %115, %cst_33 {dimension_numbers = #tpu.dot_dimension_numbers<[1], [0], [0], [1], [0, 0, 1, 1], [], []>} : vector<64x4xf32>, vector<4x8xf32>, vector<64x8xf32> -> vector<64x8xf32>
    %117 = arith.addf %111, %116 : vector<64x8xf32>
    %c0_34 = arith.constant 0 : index
    %c0_35 = arith.constant 0 : index
    %c0_36 = arith.constant 0 : index
    %c0_37 = arith.constant 0 : index
    %c0_38 = arith.constant 0 : index
    %118 = vector.load %arg5[%c0_34, %c0_35, %c0_36, %c0_37, %c0_38] : memref<1x1x10x10x4xf32, #tpu.memory_space<vmem>>, vector<1x1x10x10x4xf32>
    %119 = vector.shape_cast %118 : vector<1x1x10x10x4xf32> to vector<10x10x4xf32>
    %cst_39 = arith.constant 0.000000e+00 : f32
    %120 = vector.broadcast %cst_39 : f32 to vector<10x10x4xf32>
    %121 = arith.maximumf %119, %120 : vector<10x10x4xf32>
    %122 = vector.extract_strided_slice %121 {offsets = [0, 0, 0], sizes = [8, 8, 4], strides = [1, 1, 1]} : vector<10x10x4xf32> to vector<8x8x4xf32>
    %123 = vector.shape_cast %122 : vector<8x8x4xf32> to vector<64x4xf32>
    %124 = vector.extract_strided_slice %0 {offsets = [2, 0, 0, 0, 0], sizes = [1, 1, 1, 4, 8], strides = [1, 1, 1, 1, 1]} : vector<3x3x3x4x8xf32> to vector<1x1x1x4x8xf32>
    %125 = vector.shape_cast %124 : vector<1x1x1x4x8xf32> to vector<4x8xf32>
    %cst_40 = arith.constant dense<0.000000e+00> : vector<64x8xf32>
    %126 = tpu.matmul %123, %125, %cst_40 {dimension_numbers = #tpu.dot_dimension_numbers<[1], [0], [0], [1], [0, 0, 1, 1], [], []>} : vector<64x4xf32>, vector<4x8xf32>, vector<64x8xf32> -> vector<64x8xf32>
    %127 = arith.addf %117, %126 : vector<64x8xf32>
    %128 = vector.extract_strided_slice %121 {offsets = [0, 1, 0], sizes = [8, 8, 4], strides = [1, 1, 1]} : vector<10x10x4xf32> to vector<8x8x4xf32>
    %129 = vector.shape_cast %128 : vector<8x8x4xf32> to vector<64x4xf32>
    %130 = vector.extract_strided_slice %0 {offsets = [2, 0, 1, 0, 0], sizes = [1, 1, 1, 4, 8], strides = [1, 1, 1, 1, 1]} : vector<3x3x3x4x8xf32> to vector<1x1x1x4x8xf32>
    %131 = vector.shape_cast %130 : vector<1x1x1x4x8xf32> to vector<4x8xf32>
    %cst_41 = arith.constant dense<0.000000e+00> : vector<64x8xf32>
    %132 = tpu.matmul %129, %131, %cst_41 {dimension_numbers = #tpu.dot_dimension_numbers<[1], [0], [0], [1], [0, 0, 1, 1], [], []>} : vector<64x4xf32>, vector<4x8xf32>, vector<64x8xf32> -> vector<64x8xf32>
    %133 = arith.addf %127, %132 : vector<64x8xf32>
    %134 = vector.extract_strided_slice %121 {offsets = [0, 2, 0], sizes = [8, 8, 4], strides = [1, 1, 1]} : vector<10x10x4xf32> to vector<8x8x4xf32>
    %135 = vector.shape_cast %134 : vector<8x8x4xf32> to vector<64x4xf32>
    %136 = vector.extract_strided_slice %0 {offsets = [2, 0, 2, 0, 0], sizes = [1, 1, 1, 4, 8], strides = [1, 1, 1, 1, 1]} : vector<3x3x3x4x8xf32> to vector<1x1x1x4x8xf32>
    %137 = vector.shape_cast %136 : vector<1x1x1x4x8xf32> to vector<4x8xf32>
    %cst_42 = arith.constant dense<0.000000e+00> : vector<64x8xf32>
    %138 = tpu.matmul %135, %137, %cst_42 {dimension_numbers = #tpu.dot_dimension_numbers<[1], [0], [0], [1], [0, 0, 1, 1], [], []>} : vector<64x4xf32>, vector<4x8xf32>, vector<64x8xf32> -> vector<64x8xf32>
    %139 = arith.addf %133, %138 : vector<64x8xf32>
    %140 = vector.extract_strided_slice %121 {offsets = [1, 0, 0], sizes = [8, 8, 4], strides = [1, 1, 1]} : vector<10x10x4xf32> to vector<8x8x4xf32>
    %141 = vector.shape_cast %140 : vector<8x8x4xf32> to vector<64x4xf32>
    %142 = vector.extract_strided_slice %0 {offsets = [2, 1, 0, 0, 0], sizes = [1, 1, 1, 4, 8], strides = [1, 1, 1, 1, 1]} : vector<3x3x3x4x8xf32> to vector<1x1x1x4x8xf32>
    %143 = vector.shape_cast %142 : vector<1x1x1x4x8xf32> to vector<4x8xf32>
    %cst_43 = arith.constant dense<0.000000e+00> : vector<64x8xf32>
    %144 = tpu.matmul %141, %143, %cst_43 {dimension_numbers = #tpu.dot_dimension_numbers<[1], [0], [0], [1], [0, 0, 1, 1], [], []>} : vector<64x4xf32>, vector<4x8xf32>, vector<64x8xf32> -> vector<64x8xf32>
    %145 = arith.addf %139, %144 : vector<64x8xf32>
    %146 = vector.extract_strided_slice %121 {offsets = [1, 1, 0], sizes = [8, 8, 4], strides = [1, 1, 1]} : vector<10x10x4xf32> to vector<8x8x4xf32>
    %147 = vector.shape_cast %146 : vector<8x8x4xf32> to vector<64x4xf32>
    %148 = vector.extract_strided_slice %0 {offsets = [2, 1, 1, 0, 0], sizes = [1, 1, 1, 4, 8], strides = [1, 1, 1, 1, 1]} : vector<3x3x3x4x8xf32> to vector<1x1x1x4x8xf32>
    %149 = vector.shape_cast %148 : vector<1x1x1x4x8xf32> to vector<4x8xf32>
    %cst_44 = arith.constant dense<0.000000e+00> : vector<64x8xf32>
    %150 = tpu.matmul %147, %149, %cst_44 {dimension_numbers = #tpu.dot_dimension_numbers<[1], [0], [0], [1], [0, 0, 1, 1], [], []>} : vector<64x4xf32>, vector<4x8xf32>, vector<64x8xf32> -> vector<64x8xf32>
    %151 = arith.addf %145, %150 : vector<64x8xf32>
    %152 = vector.extract_strided_slice %121 {offsets = [1, 2, 0], sizes = [8, 8, 4], strides = [1, 1, 1]} : vector<10x10x4xf32> to vector<8x8x4xf32>
    %153 = vector.shape_cast %152 : vector<8x8x4xf32> to vector<64x4xf32>
    %154 = vector.extract_strided_slice %0 {offsets = [2, 1, 2, 0, 0], sizes = [1, 1, 1, 4, 8], strides = [1, 1, 1, 1, 1]} : vector<3x3x3x4x8xf32> to vector<1x1x1x4x8xf32>
    %155 = vector.shape_cast %154 : vector<1x1x1x4x8xf32> to vector<4x8xf32>
    %cst_45 = arith.constant dense<0.000000e+00> : vector<64x8xf32>
    %156 = tpu.matmul %153, %155, %cst_45 {dimension_numbers = #tpu.dot_dimension_numbers<[1], [0], [0], [1], [0, 0, 1, 1], [], []>} : vector<64x4xf32>, vector<4x8xf32>, vector<64x8xf32> -> vector<64x8xf32>
    %157 = arith.addf %151, %156 : vector<64x8xf32>
    %158 = vector.extract_strided_slice %121 {offsets = [2, 0, 0], sizes = [8, 8, 4], strides = [1, 1, 1]} : vector<10x10x4xf32> to vector<8x8x4xf32>
    %159 = vector.shape_cast %158 : vector<8x8x4xf32> to vector<64x4xf32>
    %160 = vector.extract_strided_slice %0 {offsets = [2, 2, 0, 0, 0], sizes = [1, 1, 1, 4, 8], strides = [1, 1, 1, 1, 1]} : vector<3x3x3x4x8xf32> to vector<1x1x1x4x8xf32>
    %161 = vector.shape_cast %160 : vector<1x1x1x4x8xf32> to vector<4x8xf32>
    %cst_46 = arith.constant dense<0.000000e+00> : vector<64x8xf32>
    %162 = tpu.matmul %159, %161, %cst_46 {dimension_numbers = #tpu.dot_dimension_numbers<[1], [0], [0], [1], [0, 0, 1, 1], [], []>} : vector<64x4xf32>, vector<4x8xf32>, vector<64x8xf32> -> vector<64x8xf32>
    %163 = arith.addf %157, %162 : vector<64x8xf32>
    %164 = vector.extract_strided_slice %121 {offsets = [2, 1, 0], sizes = [8, 8, 4], strides = [1, 1, 1]} : vector<10x10x4xf32> to vector<8x8x4xf32>
    %165 = vector.shape_cast %164 : vector<8x8x4xf32> to vector<64x4xf32>
    %166 = vector.extract_strided_slice %0 {offsets = [2, 2, 1, 0, 0], sizes = [1, 1, 1, 4, 8], strides = [1, 1, 1, 1, 1]} : vector<3x3x3x4x8xf32> to vector<1x1x1x4x8xf32>
    %167 = vector.shape_cast %166 : vector<1x1x1x4x8xf32> to vector<4x8xf32>
    %cst_47 = arith.constant dense<0.000000e+00> : vector<64x8xf32>
    %168 = tpu.matmul %165, %167, %cst_47 {dimension_numbers = #tpu.dot_dimension_numbers<[1], [0], [0], [1], [0, 0, 1, 1], [], []>} : vector<64x4xf32>, vector<4x8xf32>, vector<64x8xf32> -> vector<64x8xf32>
    %169 = arith.addf %163, %168 : vector<64x8xf32>
    %170 = vector.extract_strided_slice %121 {offsets = [2, 2, 0], sizes = [8, 8, 4], strides = [1, 1, 1]} : vector<10x10x4xf32> to vector<8x8x4xf32>
    %171 = vector.shape_cast %170 : vector<8x8x4xf32> to vector<64x4xf32>
    %172 = vector.extract_strided_slice %0 {offsets = [2, 2, 2, 0, 0], sizes = [1, 1, 1, 4, 8], strides = [1, 1, 1, 1, 1]} : vector<3x3x3x4x8xf32> to vector<1x1x1x4x8xf32>
    %173 = vector.shape_cast %172 : vector<1x1x1x4x8xf32> to vector<4x8xf32>
    %cst_48 = arith.constant dense<0.000000e+00> : vector<64x8xf32>
    %174 = tpu.matmul %171, %173, %cst_48 {dimension_numbers = #tpu.dot_dimension_numbers<[1], [0], [0], [1], [0, 0, 1, 1], [], []>} : vector<64x4xf32>, vector<4x8xf32>, vector<64x8xf32> -> vector<64x8xf32>
    %175 = arith.addf %169, %174 : vector<64x8xf32>
    %c0_49 = arith.constant 0 : index
    %c0_50 = arith.constant 0 : index
    %c0_51 = arith.constant 0 : index
    %c0_52 = arith.constant 0 : index
    %176 = vector.load %arg6[%c0_49, %c0_50, %c0_51, %c0_52] : memref<1x1x64x8xf32, #tpu.memory_space<vmem>>, vector<1x1x64x8xf32>
    %177 = vector.shape_cast %176 : vector<1x1x64x8xf32> to vector<64x8xf32>
    %178 = vector.shape_cast %175 : vector<64x8xf32> to vector<1x1x64x8xf32>
    tpu.vector_store %arg6[%c0_49, %c0_50, %c0_51, %c0_52], %178 {strides = array<i32>} : memref<1x1x64x8xf32, #tpu.memory_space<vmem>>, vector<1x1x64x8xf32>,
    %cst_53 = arith.constant dense<0.000000e+00> : vector<8xf32>
    %179 = vector.multi_reduction <add>, %175, %cst_53 [0] : vector<64x8xf32> to vector<8xf32>
    %180 = vector.shape_cast %179 : vector<8xf32> to vector<1x8xf32>
    %181 = arith.mulf %175, %175 : vector<64x8xf32>
    %cst_54 = arith.constant dense<0.000000e+00> : vector<8xf32>
    %182 = vector.multi_reduction <add>, %181, %cst_54 [0] : vector<64x8xf32> to vector<8xf32>
    %183 = vector.shape_cast %182 : vector<8xf32> to vector<1x8xf32>
    %184 = tpu.concatenate %180, %183 in 0 : vector<1x8xf32>, vector<1x8xf32> -> vector<2x8xf32>
    %c0_55 = arith.constant 0 : index
    %c0_56 = arith.constant 0 : index
    %c0_57 = arith.constant 0 : index
    %c0_58 = arith.constant 0 : index
    %185 = vector.load %arg7[%c0_55, %c0_56, %c0_57, %c0_58] : memref<1x1x2x8xf32, #tpu.memory_space<vmem>>, vector<1x1x2x8xf32>
    %186 = vector.shape_cast %185 : vector<1x1x2x8xf32> to vector<2x8xf32>
    %187 = vector.shape_cast %184 : vector<2x8xf32> to vector<1x1x2x8xf32>
    tpu.vector_store %arg7[%c0_55, %c0_56, %c0_57, %c0_58], %187 {strides = array<i32>} : memref<1x1x2x8xf32, #tpu.memory_space<vmem>>, vector<1x1x2x8xf32>,
    return
  }
  func.func @transform_0(%arg0: i32, %arg1: i32) -> (i32, i32, i32, i32, i32) {
    %c0_i32 = arith.constant 0 : i32
    %c0_i32_0 = arith.constant 0 : i32
    %c0_i32_1 = arith.constant 0 : i32
    %c0_i32_2 = arith.constant 0 : i32
    %c0_i32_3 = arith.constant 0 : i32
    %c0_i32_4 = arith.constant 0 : i32
    return %c0_i32, %c0_i32_0, %c0_i32_1, %c0_i32_2, %c0_i32_3 : i32, i32, i32, i32, i32
  }
  func.func @transform_1(%arg0: i32, %arg1: i32) -> (i32, i32, i32, i32, i32) {
    %c1_i32 = arith.constant 1 : i32
    %0 = arith.muli %arg1, %c1_i32 : i32
    %c0_i32 = arith.constant 0 : i32
    %1 = arith.addi %0, %c0_i32 : i32
    %c0_i32_0 = arith.constant 0 : i32
    %c0_i32_1 = arith.constant 0 : i32
    %c0_i32_2 = arith.constant 0 : i32
    %c0_i32_3 = arith.constant 0 : i32
    return %arg0, %1, %c0_i32_0, %c0_i32_1, %c0_i32_2 : i32, i32, i32, i32, i32
  }
  func.func @transform_2(%arg0: i32, %arg1: i32) -> (i32, i32, i32, i32, i32) {
    %c1_i32 = arith.constant 1 : i32
    %0 = arith.muli %arg1, %c1_i32 : i32
    %c1_i32_0 = arith.constant 1 : i32
    %1 = arith.addi %0, %c1_i32_0 : i32
    %c0_i32 = arith.constant 0 : i32
    %c0_i32_1 = arith.constant 0 : i32
    %c0_i32_2 = arith.constant 0 : i32
    %c0_i32_3 = arith.constant 0 : i32
    return %arg0, %1, %c0_i32, %c0_i32_1, %c0_i32_2 : i32, i32, i32, i32, i32
  }
  func.func @transform_3(%arg0: i32, %arg1: i32) -> (i32, i32, i32, i32, i32) {
    %c1_i32 = arith.constant 1 : i32
    %0 = arith.muli %arg1, %c1_i32 : i32
    %c2_i32 = arith.constant 2 : i32
    %1 = arith.addi %0, %c2_i32 : i32
    %c0_i32 = arith.constant 0 : i32
    %c0_i32_0 = arith.constant 0 : i32
    %c0_i32_1 = arith.constant 0 : i32
    %c0_i32_2 = arith.constant 0 : i32
    return %arg0, %1, %c0_i32, %c0_i32_0, %c0_i32_1 : i32, i32, i32, i32, i32
  }
  func.func @transform_4(%arg0: i32, %arg1: i32) -> (i32, i32, i32, i32) {
    %c0_i32 = arith.constant 0 : i32
    %c0_i32_0 = arith.constant 0 : i32
    %c0_i32_1 = arith.constant 0 : i32
    return %arg0, %arg1, %c0_i32, %c0_i32_0 : i32, i32, i32, i32
  }
  func.func @transform_5(%arg0: i32, %arg1: i32) -> (i32, i32, i32, i32) {
    %c0_i32 = arith.constant 0 : i32
    %c0_i32_0 = arith.constant 0 : i32
    %c0_i32_1 = arith.constant 0 : i32
    return %arg0, %arg1, %c0_i32, %c0_i32_0 : i32, i32, i32, i32
  }
}

</mosaic_0001>

<bundles_post_ra>
// kernel: tpu_custom_call.1
= control target key start
LH: loop header
LB: loop body
LE: loop exit
PB: predicated region body
PF: predicated region fallthrough
CT: control target
= control target key end

     0   :  { %11 = vsyncpa [#allocation3], 0  ;;  %s6860_s0 = inlined_call_operand.vmem [shape: f32[3,3,3,4,8], index: 0, kind: input, shape index: {}]   ;;  %s6861_s1 = inlined_call_operand.vmem [shape: f32[2,10,10,10,4], index: 1, kind: input, shape index: {}]   ;;  %s6862_s2 = inlined_call_operand.vmem [shape: f32[2,10,10,10,4], index: 2, kind: input, shape index: {}]   ;;  %s6863_s3 = inlined_call_operand.vmem [shape: f32[2,10,10,10,4], index: 3, kind: input, shape index: {}]   ;;  %s6864_s4 = inlined_call_operand.vmem [shape: f32[2,8,64,8], index: 4, kind: output, shape index: {0}]   ;;  %s6865_s5 = inlined_call_operand.hbm [shape: f32[2,8,2,8], index: 5, kind: output, shape index: {1}]  }
   0x1   :  { %13 = vsyncpa [#allocation3 + $0x1], 0  ;;  %s5592_s18 = smov 0   ;;  %s5594_s19 = smov 0  }
   0x2   :  { %s5596_s20 = smov 0   ;;  %s5598_s21 = smov 0  }
   0x3   :  { %s5600_s22 = smov 0   ;;  %s5602_s23 = smov 0  }
   0x4   :  { %s5604_s24 = smov 0   ;;  %s5606_s25 = smov 0  }
   0x5 LB: > { %s4298_s26 = sadd.s32 4294967295, %s5559_s25   ;;  %s4299_s27 = sadd.s32 4294967294, %s5559_s25   ;;  %s5559_s25 = sphi %s5606_s25, %s19_s25   ;;  %s5555_s24 = sphi %s5604_s24, %s6947_s24   ;;  %s5551_s23 = sphi %s5602_s23, %s6946_s23   ;;  %s5547_s22 = sphi %s5600_s22, %s6945_s22   ;;  %s5543_s21 = sphi %s5598_s21, %s6944_s21   ;;  %s5539_s20 = sphi %s5596_s20, %s6943_s20   ;;  %s5535_s19 = sphi %s5594_s19, %s6942_s19   ;;  %s5531_s18 = sphi %s5592_s18, %s6941_s18  }
   0x6   : > { %s28_s28 = sadd.s32 1, %s5551_s23  ;;  %s31_s29 = sadd.s32 1, %s5555_s24 }
   0x7   : > { %p29_p0 = scmp.ge.s32.totalorder %s28_s28, 8  ;;  %p187_p1 = scmp.ne.s32.totalorder %s5539_s20, %s5535_s19 }
   0x8   : > { %p188_p2 = scmp.eq.s32.totalorder %s4298_s26, 15  ;;  %p193_p5 = scmp.ne.s32.totalorder %s5535_s19, %s5531_s18 }
   0x9   : > { %s6949_s28 = smov (%p29_p0, %s28_s28), 0  ;;  %s6951_s29 = smov (!%p29_p0, %s31_s29), %s5555_s24 }
   0xa   : > { %s173_s30 = ssub.s32 %s5551_s23, %s6949_s28  ;;  %p5643_p3 = por %p188_p2, %p187_p1 }
   0xb   : > { %p33_p4 = scmp.ge.s32.totalorder %s6951_s29, 2  ;;  %p194_p6 = scmp.eq.s32.totalorder %s4299_s27, 15 }
   0xc   : > { %p4302_p7 = scmp.ge.s32.totalorder %s5559_s25, 1  ;;  %p255_p9 = scmp.lt.s32.totalorder %s5559_s25, 17 }
   0xd   : > { %s6953_s29 = smov (%p33_p4, %s6951_s29), 0  ;;  %p5652_p8 = por %p194_p6, %p193_p5 }
   0xe   : > { %s172_s8 = ssub.s32 %s5555_s24, %s6953_s29  ;;  %s177_s9 = sadd.s32 1, %s5539_s20 }
   0xf   : > { %s174_s10 = sor.u32 %s173_s30, %s172_s8  ;;  %p256_p10 = pnand %p4302_p7, %p255_p9 }
  0x10   : > { %p175_p11 = scmp.eq.s32.totalorder %s174_s10, 0 }
  0x11   : > { %259 = sbr.rel (%p256_p10) target bundleno = 506 (0x1fa), region = 36 }
  0x12   : > { %s5661_s11 = scalar_select %p175_p11, %s5539_s20, %s177_s9  }
  0x18   : > { %v357_v0 = vld [vmem:[%s6860_s0 + $0x4] sm:$0xf]  ;;  %vm481_vm0 = vcmask 1043456   ;;  %v369_v1 = vld [vmem:[%s6860_s0 + $0x34] sm:$0xf]  ;;  %p316_p12 = scmp.lt.s32.totalorder %s5547_s22, 1 }
  0x19   : > { %4801 = vmatprep.subr.msk.mxu1 %vm481_vm0, %v357_v0  ;;  %4983 = vmatprep.subr.msk.mxu0 %vm481_vm0, %v369_v1  ;;  %p318_p13 = scmp.lt.s32.totalorder %s5543_s21, 9  ;;  %v5676_v2 = vld [vmem:[%s6860_s0] sm:$0xf]  ;;  %s325_s26 = sadd.s32 1, %s5543_s21  ;;  %v5687_v3 = vld [vmem:[%s6860_s0 + $0x38] sm:$0xf] }
  0x1a   : > { %4802 = vmatpush3.msk.msra.mxu1 %vm481_vm0, %v357_v0  ;;  %s5681_s27 = scalar_select %p316_p12, %s5547_s22, 1  ;;  %4984 = vmatpush3.msk.msra.mxu0 %vm481_vm0, %v369_v1  ;;  %vm439_vm1 = vcmask 1046528   ;;  %vm464_vm2 = vcmask 31744   ;;  %v5745_v24 = vld [vmem:[%s6860_s0 + $0x8] sm:$0xf]  ;;  %vm714_vm3 = vcmask 1045504  }
  0x1b   : > { %s319_s9 = scalar_select %p318_p13, %s5543_s21, 9  ;;  %4815 = vmatprep.subr.msk.mxu1 %vm481_vm0, %v5676_v2  ;;  %4997 = vmatprep.subr.msk.mxu0 %vm481_vm0, %v5687_v3  ;;  %v5790_v48 = vld [vmem:[%s6860_s0 + $0x3c] sm:$0xf]  ;;  %vm4043_vm4 = vcmask 64512   ;;  %vm4102_vm5 = vcmask 1040384   ;;  %vm4104_vm6 = vcmask 58368  }
  0x1c   : > { %s5695_s10 = smul.u32 200, %s5681_s27  ;;  %p328_p0 = scmp.lt.s32.totalorder %s325_s26, 9 }
  0x1d   : > { %s5389_s12 = smul.u32 20, %s319_s9  ;;  %p349_p2 = scmp.lt.s32.totalorder %s5543_s21, 7 }
  0x1e   : > { %s6955_s26 = smov (!%p328_p0, %s325_s26), 9 }
  0x1f   : > { %s322_s13 = sadd.s32 %s5695_s10, %s5389_s12  ;;  %s5391_s15 = smul.u32 20, %s6955_s26 }
  0x20   : > { %s4304_s14 = sshll.u32 %s322_s13, 3 }
  0x21   : > { %s5701_s30 = scalar_lea.vmem %s6861_s1, %s4304_s14  ;;  %s332_s8 = sadd.s32 %s5391_s15, %s5695_s10 }
  0x22   : > { %v383_v4 = vld [vmem:[%s5701_s30] sm:$0xff]  ;;  %v5705_v5 = vld [vmem:[%s5701_s30 + $0x8] sm:$0x3]  ;;  %v385_v6 = vld [vmem:[%s5701_s30 + $0x10] sm:$0xff]  ;;  %s4305_s26 = sshll.u32 %s332_s8, 3  ;;  %s336_s14 = sadd.s32 2, %s5543_s21 }
  0x23   : > { %v5709_v7 = vmax.f32 %v383_v4, 0.0  ;;  %v404_v8 = vmax.f32 %v5705_v5, 0.0  ;;  %v5713_v9 = vld [vmem:[%s5701_s30 + $0x18] sm:$0x3]  ;;  %v5715_v10 = vmax.f32 %v385_v6, 0.0  ;;  %s5721_s13 = scalar_lea.vmem %s6862_s2, %s4305_s26  ;;  %v387_v12 = vld [vmem:[%s5701_s30 + $0x20] sm:$0xff] }
  0x24   : > { %v406_v11 = vmax.f32 %v5713_v9, 0.0  ;;  %v5725_v13 = vld [vmem:[%s5701_s30 + $0x28] sm:$0x3]  ;;  %v1597_v17 = vld [vmem:[%s5721_s13 + $0x10] sm:$0xff]  ;;  %v5733_v18 = vld [vmem:[%s5721_s13 + $0x18] sm:$0x3] }
  0x25   : > { %v440_v14 = vrot.slane %v5709_v7, 1  ;;  %v441_v15 = vrot.slane %v404_v8, 1  ;;  %v443_v16 = vrot.slane %v5715_v10, 1  ;;  %v5737_v20 = vmax.f32 %v1597_v17, 0.0  ;;  %v1599_v22 = vld [vmem:[%s5721_s13 + $0x20] sm:$0xff]  ;;  %v389_v23 = vld [vmem:[%s5701_s30 + $0x30] sm:$0xff] }
  0x26   : > { %v444_v19 = vrot.slane %v406_v11, 1  ;;  %v1618_v21 = vmax.f32 %v5733_v18, 0.0  ;;  %v1600_v26 = vld [vmem:[%s5721_s13 + $0x28] sm:$0x3]  ;;  %v5749_v27 = vmax.f32 %v1599_v22, 0.0  ;;  %v5751_v28 = vmax.f32 %v387_v12, 0.0 }
  0x27   : > { %v442_v25 = vsel %vm439_vm1, %v440_v14, %v441_v15  ;;  %v408_v29 = vmax.f32 %v5725_v13, 0.0  ;;  %v1601_v30 = vld [vmem:[%s5721_s13 + $0x30] sm:$0xff]  ;;  %v1786_v32 = vrot.slane %v5737_v20, 1  ;;  %v1620_v34 = vmax.f32 %v1600_v26, 0.0  ;;  %v5763_v35 = vld [vmem:[%s5701_s30 + $0x38] sm:$0x3] }
  0x28   : > { %4803 = vmatprep.mubr.msk.f32.mxu1 %vm464_vm2, %v442_v25  ;;  %v5757_v31 = vsel %vm439_vm1, %v443_v16, %v444_v19  ;;  %v1787_v33 = vrot.slane %v1618_v21, 1  ;;  %v1603_v36 = vld [vmem:[%s5721_s13 + $0x40] sm:$0xff]  ;;  %v1789_v37 = vrot.slane %v5749_v27, 1  ;;  %v446_v38 = vrot.slane %v5751_v28, 1  ;;  %v5775_v41 = vld [vmem:[%s5721_s13 + $0x38] sm:$0x3] }
  0x29   : > { %4804 = vmatmul.mubr.msk.f32.vlgmr.msra.gmra.mrb[0].mxu1 %vm464_vm2, %v5757_v31  ;;  %v447_v39 = vrot.slane %v408_v29, 1  ;;  %v5772_v40 = vmax.f32 %v389_v23, 0.0  ;;  %v1790_v43 = vrot.slane %v1620_v34, 1  ;;  %v1946_v44 = vrot.slane %v1620_v34, 2  ;;  %v5784_v46 = vld [vmem:[%s5721_s13 + $0x48] sm:$0x3] }
  0x2a   : > { %v5778_v42 = vsel %vm439_vm1, %v1786_v32, %v1787_v33  ;;  %4816 = vmatpush3.msk.msra.mxu1 %vm481_vm0, %v5676_v2  ;;  %v410_v45 = vmax.f32 %v5763_v35, 0.0  ;;  %v391_v47 = vld [vmem:[%s5701_s30 + $0x40] sm:$0xff]  ;;  %v5798_v51 = vmax.f32 %v1601_v30, 0.0  ;;  %v1622_v52 = vmax.f32 %v5775_v41, 0.0  ;;  %v5802_v53 = vld [vmem:[%s5701_s30 + $0x48] sm:$0x3] }
  0x2b   : > { %4985 = vmatprep.mubr.msk.f32.mxu0 %vm464_vm2, %v5778_v42  ;;  %v5795_v49 = vsel %vm439_vm1, %v446_v38, %v447_v39  ;;  %v449_v50 = vrot.slane %v5772_v40, 1  ;;  %v393_v54 = vld [vmem:[%s5701_s30 + $0x50] sm:$0xff]  ;;  %4829 = vmatprep.subr.msk.mxu1 %vm481_vm0, %v5745_v24  ;;  %v5808_v55 = vsel %vm439_vm1, %v1789_v37, %v1790_v43  ;;  %v5814_v57 = vmax.f32 %v1603_v36, 0.0  ;;  %v5818_v59 = vld [vmem:[%s5701_s30 + $0x58] sm:$0x3]  ;;  %v395_v6 = vld [vmem:[%s5701_s30 + $0x60] sm:$0xff] }
  0x2c   : > { %6893 = vst [vmem:[#allocation5_spill] sm:$0xff] %v5808_v55  ;;  %4806 = vmatprep.mubr.msk.f32.mxu1 %vm464_vm2, %v5795_v49  ;;  %v450_v56 = vrot.slane %v410_v45, 1  ;;  %v1624_v58 = vmax.f32 %v5784_v46, 0.0  ;;  %4986 = vmatmul.mubr.msk.f32.vlgmr.msra.gmra.mrb[0].mxu0 %vm464_vm2, %v5808_v55  ;;  %v1792_v60 = vrot.slane %v5798_v51, 1  ;;  %v1793_v61 = vrot.slane %v1622_v52, 1  ;;  %v397_v17 = vld [vmem:[%s5701_s30 + $0x70] sm:$0xff] }
  0x2d   : > { %v5823_v62 = vmax.f32 %v391_v47, 0.0  ;;  %v412_v63 = vmax.f32 %v5802_v53, 0.0  ;;  %4998 = vmatpush3.msk.msra.mxu0 %vm481_vm0, %v5687_v3  ;;  %v1795_v1 = vrot.slane %v5814_v57, 1  ;;  %v5832_v4 = vmax.f32 %v393_v54, 0.0  ;;  %v5836_v12 = vld [vmem:[%s5701_s30 + $0x68] sm:$0x3] }
  0x2e   : > { %v5829_v0 = vsel %vm439_vm1, %v449_v50, %v450_v56  ;;  %v1796_v2 = vrot.slane %v1624_v58, 1  ;;  %v5841_v14 = vsel %vm439_vm1, %v1792_v60, %v1793_v61  ;;  %v414_v16 = vmax.f32 %v5818_v59, 0.0  ;;  %5011 = vmatprep.subr.msk.mxu0 %vm481_vm0, %v5790_v48  ;;  %v5851_v19 = vld [vmem:[%s5701_s30 + $0x78] sm:$0x3]  ;;  %v1605_v38 = vld [vmem:[%s5721_s13 + $0x50] sm:$0xff]  ;;  %v1607_v50 = vld [vmem:[%s5721_s13 + $0x60] sm:$0xff] }
  0x2f   : > { %4807 = vmatmul.mubr.msk.f32.gmra.mrb[2].mxu1 %vm464_vm2, %v5829_v0  ;;  %6894 = vst [vmem:[#allocation6_spill] sm:$0xff] %v5841_v14  ;;  %v452_v15 = vrot.slane %v5823_v62, 1  ;;  %v453_v3 = vrot.slane %v412_v63, 1  ;;  %4988 = vmatprep.mubr.msk.f32.mxu0 %vm464_vm2, %v5841_v14  ;;  %v455_v23 = vrot.slane %v5832_v4, 1  ;;  %v1942_v25 = vrot.slane %v5737_v20, 2  ;;  %p339_p1 = scmp.lt.s32.totalorder %s336_s14, 9 }
  0x30   : > { %v5856_v22 = vsel %vm439_vm1, %v1795_v1, %v1796_v2  ;;  %v1943_v26 = vrot.slane %v1618_v21, 2  ;;  %v456_v32 = vrot.slane %v414_v16, 1  ;;  %v1945_v33 = vrot.slane %v5749_v27, 2  ;;  %v5883_v39 = vld [vmem:[%s5721_s13 + $0x58] sm:$0x3]  ;;  %v1613_v13 = vld [vmem:[%s5721_s13 + $0x90] sm:$0xff] }
  0x31   : > { %6895 = vst [vmem:[#allocation7_spill] sm:$0xff] %v5856_v22  ;;  %4989 = vmatmul.mubr.msk.f32.gmra.mrb[2].mxu0 %vm464_vm2, %v5856_v22  ;;  %v5865_v30 = vsel %vm439_vm1, %v452_v15, %v453_v3  ;;  %v5870_v34 = vmax.f32 %v395_v6, 0.0  ;;  %v416_v21 = vmax.f32 %v5836_v12, 0.0  ;;  %v5878_v36 = vmax.f32 %v397_v17, 0.0  ;;  %v5897_v54 = vld [vmem:[%s5721_s13 + $0x68] sm:$0x3] }
  0x32   : > { %4809 = vmatprep.mubr.msk.f32.mxu1 %vm464_vm2, %v5865_v30  ;;  %v5875_v18 = vsel %vm714_vm3, %v1942_v25, %v1943_v26  ;;  %v6867_v37 = vmax.f32 %v5851_v19, 0.0  ;;  %v5886_v41 = vsel %vm439_vm1, %v455_v23, %v456_v32  ;;  %v5891_v43 = vsel %vm714_vm3, %v1945_v33, %v1946_v44  ;;  %v5902_v56 = vld [vmem:[%s6860_s0 + $0x40] sm:$0xf]  ;;  %v5912_v2 = vld [vmem:[%s5721_s13 + $0x78] sm:$0x3]  ;;  %v1609_v23 = vld [vmem:[%s5721_s13 + $0x70] sm:$0xff] }
  0x33   : > { %6896 = vst [vmem:[#allocation8_spill] sm:$0xff] %v5875_v18  ;;  %4999 = vmatprep.mubr.msk.f32.mxu0 %vm464_vm2, %v5875_v18  ;;  %6897 = vst [vmem:[#allocation9_spill] sm:$0xff] %v5891_v43  ;;  %v458_v46 = vrot.slane %v5870_v34, 1  ;;  %v1948_v47 = vrot.slane %v5798_v51, 2  ;;  %4810 = vmatmul.mubr.msk.f32.gmra.mrb[4].mxu1 %vm464_vm2, %v5886_v41  ;;  %v459_v44 = vrot.slane %v416_v21, 1  ;;  %v461_v60 = vrot.slane %v5878_v36, 1 }
  0x34   : > { %v462_v61 = vrot.slane %v6867_v37, 1  ;;  %v1949_v1 = vrot.slane %v1622_v52, 2  ;;  %v1951_v6 = vrot.slane %v5814_v57, 2  ;;  %v1952_v15 = vrot.slane %v1624_v58, 2  ;;  %v1611_v25 = vld [vmem:[%s5721_s13 + $0x80] sm:$0xff]  ;;  %s6957_s14 = smov (!%p339_p1, %s336_s14), 9 }
  0x35   : > { %5000 = vmatmul.mubr.msk.f32.vlgmr.msra.gmra.mrb[0].mxu0 %vm464_vm2, %v5891_v43  ;;  %v5917_v3 = vmax.f32 %v1605_v38, 0.0  ;;  %v6866_v17 = vmax.f32 %v5883_v39, 0.0  ;;  %v5925_v26 = vsel %vm439_vm1, %v458_v46, %v459_v44  ;;  %v5933_v33 = vmax.f32 %v1607_v50, 0.0  ;;  %v5936_v58 = vld [vmem:[%s5721_s13 + $0x88] sm:$0x3]  ;;  %s5392_s17 = smul.u32 20, %s6957_s14 }
  0x36   : > { %5012 = vmatpush3.msk.msra.mxu0 %vm481_vm0, %v5790_v48  ;;  %v5928_v52 = vsel %vm439_vm1, %v461_v60, %v462_v61  ;;  %v5931_v32 = vsel %vm714_vm3, %v1948_v47, %v1949_v1  ;;  %4812 = vmatprep.mubr.msk.f32.mxu1 %vm464_vm2, %v5925_v26  ;;  %v5943_v48 = vsel %vm714_vm3, %v1951_v6, %v1952_v15  ;;  %v6868_v47 = vmax.f32 %v5897_v54, 0.0  ;;  %v360_v35 = vld [vmem:[%s6860_s0 + $0x10] sm:$0xf]  ;;  %s4308_s8 = sshll.u32 %s5681_s27, 6  ;;  %s313_s27 = sand.u32 1, %s5535_s19  }
  0x37   : > { %6898 = vst [vmem:[#allocation10_spill] sm:$0xff] %v5931_v32  ;;  %5002 = vmatprep.mubr.msk.f32.mxu0 %vm464_vm2, %v5931_v32  ;;  %6899 = vst [vmem:[#allocation11_spill] sm:$0xff] %v5943_v48  ;;  %v1954_v38 = vrot.slane %v5917_v3, 2  ;;  %v1955_v46 = vrot.slane %v6866_v17, 2  ;;  %4813 = vmatmul.mubr.msk.f32.gmra.mrb[6].mxu1 %vm464_vm2, %v5928_v52  ;;  %v1957_v50 = vrot.slane %v5933_v33, 2  ;;  %v5952_v44 = vmax.f32 %v1609_v23, 0.0  ;;  %s343_s9 = sadd.s32 %s5392_s17, %s5695_s10 }
  0x38   : > { %v1630_v60 = vmax.f32 %v5912_v2, 0.0  ;;  %v5955_v61 = vmax.f32 %v1611_v25, 0.0  ;;  %5025 = vmatprep.subr.msk.mxu0 %vm481_vm0, %v5902_v56  ;;  %4817 = vmatprep.mubr.msk.f32.mxu1 %vm464_vm2, %v5709_v7  ;;  %v1958_v6 = vrot.slane %v6868_v47, 2  ;;  %v1632_v15 = vmax.f32 %v5936_v58, 0.0  ;;  %v359_v47 = vld [vmem:[%s6860_s0 + $0xc] sm:$0xf] }
  0x39   : > { %5003 = vmatmul.mubr.msk.f32.gmra.mrb[2].mxu0 %vm464_vm2, %v5943_v48  ;;  %v5964_v1 = vsel %vm714_vm3, %v1954_v38, %v1955_v46  ;;  %v1960_v23 = vrot.slane %v5952_v44, 2  ;;  %v718_v5 = vrot.slane %v5715_v10, 2  ;;  %v722_v9 = vrot.slane %v408_v29, 2  ;;  %s4306_s10 = sshll.u32 %s343_s9, 3  ;;  %s4303_s12 = sshll.u32 %s313_s27, 1 }
  0x3a   : > { %6900 = vst [vmem:[#allocation12_spill] sm:$0xff] %v5955_v61  ;;  %6901 = vst [vmem:[#allocation13_spill] sm:$0xff] %v5964_v1  ;;  %5005 = vmatprep.mubr.msk.f32.mxu0 %vm464_vm2, %v5964_v1  ;;  %v1961_v25 = vrot.slane %v1630_v60, 2  ;;  %v2336_v17 = vrot.slane %v5955_v61, 2  ;;  %v5976_v37 = vsel %vm714_vm3, %v1957_v50, %v1958_v6  ;;  %v2337_v38 = vrot.slane %v1632_v15, 2  ;;  %s6116_s17 = scalar_lea.vmem %s6863_s3, %s4306_s10  ;;  %s4554_s14 = sshll.u32 %s5547_s22, 3 }
  0x3b   : > { %6902 = vst [vmem:[#allocation14_spill] sm:$0xff] %v5976_v37  ;;  %4818 = vmatmul.mubr.msk.f32.vlgmr.msra.gmra.mrb[0].mxu1 %vm464_vm2, %v5715_v10  ;;  %v373_v6 = vld [vmem:[%s6860_s0 + $0x44] sm:$0xf]  ;;  %v727_v29 = vrot.slane %v5823_v62, 2  ;;  %v6067_v53 = vmax.f32 %v1613_v13, 0.0  ;;  %v6904_v12 = vmax.f32 %v5851_v19, 0.0  ;;  %s4130_s15 = sadd.s32 %s5543_s21, %s4554_s14 }
  0x3c   : > { %v5983_v46 = vsel %vm714_vm3, %v1960_v23, %v1961_v25  ;;  %4830 = vmatpush3.msk.msra.mxu1 %vm481_vm0, %v5745_v24  ;;  %4820 = vmatprep.mubr.msk.f32.mxu1 %vm464_vm2, %v5751_v28  ;;  %v5997_v50 = vsel %vm714_vm3, %v2336_v17, %v2337_v38  ;;  %v715_v24 = vrot.slane %v5709_v7, 2  ;;  %v716_v17 = vrot.slane %v404_v8, 2  ;;  %v374_v19 = vld [vmem:[%s6860_s0 + $0x48] sm:$0xf]  ;;  %s5561_s9 = smov [#allocation2]  }
  0x3d   : > { %6903 = vst [vmem:[#allocation15_spill] sm:$0xff] %v5983_v46  ;;  %5006 = vmatmul.mubr.msk.f32.gmra.mrb[4].mxu0 %vm464_vm2, %v5976_v37  ;;  %4843 = vmatprep.subr.msk.mxu1 %vm481_vm0, %v359_v47  ;;  %v719_v23 = vrot.slane %v406_v11, 2  ;;  %v721_v8 = vrot.slane %v5751_v28, 2  ;;  %v725_v25 = vrot.slane %v410_v45, 2  ;;  %v728_v38 = vrot.slane %v412_v63, 2 }
  0x3e   : > { %5008 = vmatprep.mubr.msk.f32.mxu0 %vm464_vm2, %v5983_v46  ;;  %v717_v7 = vsel %vm714_vm3, %v715_v24, %v716_v17  ;;  %v730_v63 = vrot.slane %v5832_v4, 2  ;;  %v731_v17 = vrot.slane %v414_v16, 2  ;;  %v736_v16 = vrot.slane %v5878_v36, 2 }
  0x3f   : > { %4821 = vmatmul.mubr.msk.f32.gmra.mrb[2].mxu1 %vm464_vm2, %v5772_v40  ;;  %v6041_v11 = vsel %vm714_vm3, %v718_v5, %v719_v23  ;;  %v6054_v24 = vsel %vm714_vm3, %v721_v8, %v722_v9  ;;  %v733_v23 = vrot.slane %v5870_v34, 2  ;;  %v734_v5 = vrot.slane %v416_v21, 2 }
  0x40   : > { %4823 = vmatprep.mubr.msk.f32.mxu1 %vm464_vm2, %v5823_v62  ;;  %v6091_v59 = vsel %vm714_vm3, %v730_v63, %v731_v17  ;;  %v737_v21 = vrot.slane %v6904_v12, 2  ;;  %v1798_v8 = vrot.slane %v5917_v3, 1  ;;  %v6905_v9 = vmax.f32 %v5883_v39, 0.0  ;;  %v2836_v12 = vld [vmem:[%s6116_s17 + $0x88] sm:$0x3] }
  0x41   : > { %5009 = vmatmul.mubr.msk.f32.gmra.mrb[6].mxu0 %vm464_vm2, %v5997_v50  ;;  %v6906_v13 = vmax.f32 %v5897_v54, 0.0  ;;  %v2835_v54 = vld [vmem:[%s6116_s17 + $0x80] sm:$0xff]  ;;  %v1804_v17 = vrot.slane %v5952_v44, 1  ;;  %v2856_v2 = vmax.f32 %v2836_v12, 0.0  ;;  %v375_v12 = vld [vmem:[%s6860_s0 + $0x4c] sm:$0xf] }
  0x42   : > { %5013 = vmatprep.mubr.msk.f32.mxu0 %vm464_vm2, %v5749_v27  ;;  %v6123_v39 = vsel %vm714_vm3, %v736_v16, %v737_v21  ;;  %v2215_v16 = vrot.slane %v5955_v61, 1  ;;  %v6145_v21 = vmax.f32 %v2835_v54, 0.0 }
  0x43   : > { %4824 = vmatmul.mubr.msk.f32.gmra.mrb[4].mxu1 %vm464_vm2, %v5832_v4 }
  0x44   : > { %4826 = vmatprep.mubr.msk.f32.mxu1 %vm464_vm2, %v5870_v34 }
  0x45   : > { %5014 = vmatmul.mubr.msk.f32.vlgmr.msra.gmra.mrb[0].mxu0 %vm464_vm2, %v5798_v51 }
  0x46   : > { %5026 = vmatpush3.msk.msra.mxu0 %vm481_vm0, %v5902_v56  ;;  %5016 = vmatprep.mubr.msk.f32.mxu0 %vm464_vm2, %v5814_v57  ;;  %v724_v56 = vrot.slane %v5772_v40, 2 }
  0x47   : > { %5039 = vmatprep.subr.msk.mxu0 %vm481_vm0, %v373_v6  ;;  %4827 = vmatmul.mubr.msk.f32.gmra.mrb[6].mxu1 %vm464_vm2, %v5878_v36 }
  0x48   : > { %4831 = vmatprep.mubr.msk.f32.mxu1 %vm464_vm2, %v717_v7  ;;  %v6065_v45 = vsel %vm714_vm3, %v724_v56, %v725_v25  ;;  %v6099_v7 = vsel %vm714_vm3, %v733_v23, %v734_v5  ;;  %v1799_v56 = vrot.slane %v6905_v9, 1  ;;  %v1801_v25 = vrot.slane %v5933_v33, 1 }
  0x49   : > { %5017 = vmatmul.mubr.msk.f32.gmra.mrb[2].mxu0 %vm464_vm2, %v5917_v3  ;;  %v1805_v23 = vrot.slane %v1630_v60, 1  ;;  %v2577_v60 = vrot.slane %v6067_v53, 1 }
  0x4a   : > { %5019 = vmatprep.mubr.msk.f32.mxu0 %vm464_vm2, %v5933_v33  ;;  %v6130_v63 = vsel %vm439_vm1, %v1798_v8, %v1799_v56  ;;  %v3439_v8 = vrot.slane %v6145_v21, 1 }
  0x4b   : > { %4832 = vmatmul.mubr.msk.f32.vlgmr.msra.gmra.mrb[0].mxu1 %vm464_vm2, %v6041_v11  ;;  %6907 = vst [vmem:[#allocation16_spill] sm:$0xff] %v6130_v63  ;;  %v6154_v58 = vsel %vm439_vm1, %v1804_v17, %v1805_v23 }
  0x4c   : > { %4844 = vmatpush3.msk.msra.mxu1 %vm481_vm0, %v359_v47  ;;  %4834 = vmatprep.mubr.msk.f32.mxu1 %vm464_vm2, %v6054_v24  ;;  %v6077_v47 = vsel %vm714_vm3, %v727_v29, %v728_v38  ;;  %v1802_v29 = vrot.slane %v6906_v13, 1  ;;  %v1614_v38 = vld [vmem:[%s5721_s13 + $0x98] sm:$0x3]  ;;  %6909 = vst [vmem:[#allocation18_spill] sm:$0xff] %v6154_v58  ;;  %v3560_v13 = vrot.slane %v6145_v21, 2 }
  0x4d   : > { %5020 = vmatmul.mubr.msk.f32.gmra.mrb[4].mxu0 %vm464_vm2, %v5952_v44  ;;  %4857 = vmatprep.subr.msk.mxu1 %vm481_vm0, %v360_v35  ;;  %v1634_v5 = vmax.f32 %v1614_v38, 0.0 }
  0x4e   : > { %5022 = vmatprep.mubr.msk.f32.mxu0 %vm464_vm2, %v5955_v61  ;;  %v6137_v9 = vsel %vm439_vm1, %v1801_v25, %v1802_v29  ;;  %v3440_v25 = vrot.slane %v2856_v2, 1  ;;  %v361_v29 = vld [vmem:[%s6860_s0 + $0x14] sm:$0xf] }
  0x4f   : > { %4835 = vmatmul.mubr.msk.f32.gmra.mrb[2].mxu1 %vm464_vm2, %v6065_v45  ;;  %6908 = vst [vmem:[#allocation17_spill] sm:$0xff] %v6137_v9 }
  0x50   : > { %4837 = vmatprep.mubr.msk.f32.mxu1 %vm464_vm2, %v6077_v47  ;;  %v6171_v38 = vsel %vm439_vm1, %v3439_v8, %v3440_v25  ;;  %v2823_v8 = vld [vmem:[%s6116_s17 + $0x20] sm:$0xff] }
  0x51   : > { %5023 = vmatmul.mubr.msk.f32.gmra.mrb[6].mxu0 %vm464_vm2, %v6067_v53 }
  0x52   : > { %5027 = vmatprep.mubr.msk.f32.mxu0 %vm464_vm2, %v5808_v55  ;;  %v6367_v55 = vld [vmem:[%s6116_s17 + $0x78] sm:$0x3] }
  0x53   : > { %4838 = vmatmul.mubr.msk.f32.gmra.mrb[4].mxu1 %vm464_vm2, %v6091_v59 }
  0x54   : > { %4840 = vmatprep.mubr.msk.f32.mxu1 %vm464_vm2, %v6099_v7 }
  0x55   : > { %5028 = vmatmul.mubr.msk.f32.vlgmr.msra.gmra.mrb[0].mxu0 %vm464_vm2, %v5841_v14 }
  0x56   : > { %5040 = vmatpush3.msk.msra.mxu0 %vm481_vm0, %v373_v6  ;;  %5030 = vmatprep.mubr.msk.f32.mxu0 %vm464_vm2, %v5856_v22  ;;  %v2216_v6 = vrot.slane %v1632_v15, 1  ;;  %v2578_v15 = vrot.slane %v1634_v5, 1 }
  0x57   : > { %5053 = vmatprep.subr.msk.mxu0 %vm481_vm0, %v374_v19  ;;  %4841 = vmatmul.mubr.msk.f32.gmra.mrb[6].mxu1 %vm464_vm2, %v6123_v39 }
  0x58   : > { %4845 = vmatprep.mubr.msk.f32.mxu1 %vm464_vm2, %v5715_v10  ;;  %v6159_v56 = vsel %vm439_vm1, %v2215_v16, %v2216_v6  ;;  %v3561_v10 = vrot.slane %v2856_v2, 2  ;;  %v2579_v17 = vsel %vm439_vm1, %v2577_v60, %v2578_v15  ;;  %v2699_v16 = vrot.slane %v1634_v5, 2  ;;  %v6215_v6 = vld [vmem:[%s5701_s30 + $0x88] sm:$0x3]  ;;  %v2819_v2 = vld [vmem:[%s6116_s17] sm:$0xff]  ;;  %v2821_v15 = vld [vmem:[%s6116_s17 + $0x10] sm:$0xff] }
  0x59   : > { %5031 = vmatmul.mubr.msk.f32.gmra.mrb[2].mxu0 %vm464_vm2, %v6130_v63  ;;  %6910 = vst [vmem:[#allocation19_spill] sm:$0xff] %v6159_v56  ;;  %v362_v60 = vld [vmem:[%s6860_s0 + $0x18] sm:$0xf]  ;;  %v6232_v5 = vmax.f32 %v2819_v2, 0.0  ;;  %v6242_v25 = vmax.f32 %v2821_v15, 0.0  ;;  %v2829_v15 = vld [vmem:[%s6116_s17 + $0x50] sm:$0xff] }
  0x5a   : > { %5033 = vmatprep.mubr.msk.f32.mxu0 %vm464_vm2, %v6137_v9  ;;  %v6174_v54 = vsel %vm714_vm3, %v3560_v13, %v3561_v10  ;;  %v6249_v10 = vmax.f32 %v2823_v8, 0.0  ;;  %v2831_v8 = vld [vmem:[%s6116_s17 + $0x60] sm:$0xff] }
  0x5b   : > { %4846 = vmatmul.mubr.msk.f32.vlgmr.msra.gmra.mrb[0].mxu1 %vm464_vm2, %v5751_v28  ;;  %6911 = vst [vmem:[#allocation20_spill] sm:$0xff] %v6174_v54 }
  0x5c   : > { %4858 = vmatpush3.msk.msra.mxu1 %vm481_vm0, %v360_v35  ;;  %4848 = vmatprep.mubr.msk.f32.mxu1 %vm464_vm2, %v5772_v40  ;;  %v399_v35 = vld [vmem:[%s5701_s30 + $0x80] sm:$0xff] }
  0x5d   : > { %5034 = vmatmul.mubr.msk.f32.gmra.mrb[4].mxu0 %vm464_vm2, %v6154_v58  ;;  %4871 = vmatprep.subr.msk.mxu1 %vm481_vm0, %v361_v29  ;;  %v6192_v23 = vmax.f32 %v399_v35, 0.0  ;;  %v6256_v35 = vld [vmem:[%s6116_s17 + $0x8] sm:$0x3]  ;;  %v6337_v58 = vld [vmem:[%s6116_s17 + $0x58] sm:$0x3] }
  0x5e   : > { %5036 = vmatprep.mubr.msk.f32.mxu0 %vm464_vm2, %v6159_v56  ;;  %v3007_v56 = vrot.slane %v6232_v5, 1  ;;  %v6912_v61 = vmax.f32 %v6256_v35, 0.0  ;;  %v6890_v22 = vmax.f32 %v6337_v58, 0.0 }
  0x5f   : > { %4849 = vmatmul.mubr.msk.f32.gmra.mrb[2].mxu1 %vm464_vm2, %v5823_v62 }
  0x60   : > { %4851 = vmatprep.mubr.msk.f32.mxu1 %vm464_vm2, %v5832_v4 }
  0x61   : > { %5037 = vmatmul.mubr.msk.f32.gmra.mrb[6].mxu0 %vm464_vm2, %v2579_v17  ;;  %v2827_v17 = vld [vmem:[%s6116_s17 + $0x40] sm:$0xff] }
  0x62   : > { %5041 = vmatprep.mubr.msk.f32.mxu0 %vm464_vm2, %v5891_v43 }
  0x63   : > { %4852 = vmatmul.mubr.msk.f32.gmra.mrb[4].mxu1 %vm464_vm2, %v5870_v34 }
  0x64   : > { %4854 = vmatprep.mubr.msk.f32.mxu1 %vm464_vm2, %v5878_v36 }
  0x65   : > { %5042 = vmatmul.mubr.msk.f32.vlgmr.msra.gmra.mrb[0].mxu0 %vm464_vm2, %v5931_v32  ;;  %v3013_v32 = vrot.slane %v6249_v10, 1 }
  0x66   : > { %5054 = vmatpush3.msk.msra.mxu0 %vm481_vm0, %v374_v19  ;;  %5044 = vmatprep.mubr.msk.f32.mxu0 %vm464_vm2, %v5943_v48  ;;  %v2698_v19 = vrot.slane %v6067_v53, 2 }
  0x67   : > { %5067 = vmatprep.subr.msk.mxu0 %vm481_vm0, %v375_v12  ;;  %4855 = vmatmul.mubr.msk.f32.gmra.mrb[6].mxu1 %vm464_vm2, %v6192_v23 }
  0x68   : > { %4859 = vmatprep.mubr.msk.f32.mxu1 %vm464_vm2, %v5757_v31  ;;  %v6869_v31 = vmax.f32 %v6215_v6, 0.0  ;;  %v2700_v53 = vsel %vm714_vm3, %v2698_v19, %v2699_v16  ;;  %v6261_v19 = vld [vmem:[%s6860_s0 + $0x50] sm:$0xf] }
  0x69   : > { %5045 = vmatmul.mubr.msk.f32.gmra.mrb[2].mxu0 %vm464_vm2, %v5964_v1  ;;  %v6307_v1 = vld [vmem:[%s6116_s17 + $0x38] sm:$0x3] }
  0x6a   : > { %5047 = vmatprep.mubr.msk.f32.mxu0 %vm464_vm2, %v5976_v37  ;;  %v992_v13 = vrot.slane %v6869_v31, 1  ;;  %v6915_v9 = vmax.f32 %v6307_v1, 0.0 }
  0x6b   : > { %4860 = vmatmul.mubr.msk.f32.vlgmr.msra.gmra.mrb[0].mxu1 %vm464_vm2, %v5795_v49 }
  0x6c   : > { %4872 = vmatpush3.msk.msra.mxu1 %vm481_vm0, %v361_v29  ;;  %4862 = vmatprep.mubr.msk.f32.mxu1 %vm464_vm2, %v5829_v0  ;;  %v2825_v29 = vld [vmem:[%s6116_s17 + $0x30] sm:$0xff]  ;;  %v3017_v63 = vrot.slane %v6915_v9, 1 }
  0x6d   : > { %5048 = vmatmul.mubr.msk.f32.gmra.mrb[4].mxu0 %vm464_vm2, %v5983_v46  ;;  %4885 = vmatprep.subr.msk.mxu1 %vm481_vm0, %v362_v60  ;;  %v6270_v2 = vmax.f32 %v2825_v29, 0.0  ;;  %v6298_v29 = vmax.f32 %v2831_v8, 0.0  ;;  %v3008_v46 = vrot.slane %v6912_v61, 1  ;;  %v3010_v8 = vrot.slane %v6242_v25, 1 }
  0x6e   : > { %5050 = vmatprep.mubr.msk.f32.mxu0 %vm464_vm2, %v5997_v50  ;;  %v991_v50 = vrot.slane %v6192_v23, 1 }
  0x6f   : > { %4863 = vmatmul.mubr.msk.f32.gmra.mrb[2].mxu1 %vm464_vm2, %v5865_v30  ;;  %v3016_v48 = vrot.slane %v6270_v2, 1 }
  0x70   : > { %4865 = vmatprep.mubr.msk.f32.mxu1 %vm464_vm2, %v5886_v41  ;;  %v6268_v16 = vsel %vm439_vm1, %v991_v50, %v992_v13  ;;  %v6283_v50 = vld [vmem:[%s6116_s17 + $0x18] sm:$0x3]  ;;  %v6294_v13 = vmax.f32 %v2829_v15, 0.0  ;;  %v6315_v15 = vld [vmem:[%s6116_s17 + $0x48] sm:$0x3] }
  0x71   : > { %5051 = vmatmul.mubr.msk.f32.gmra.mrb[6].mxu0 %vm464_vm2, %v2700_v53  ;;  %v6275_v53 = vmax.f32 %v2827_v17, 0.0  ;;  %v2833_v17 = vld [vmem:[%s6116_s17 + $0x70] sm:$0xff]  ;;  %v6881_v31 = vmax.f32 %v6283_v50, 0.0 }
  0x72   : > { %5055 = vmatprep.mubr.msk.f32.mxu0 %vm464_vm2, %v6232_v5  ;;  %v6320_v61 = vmax.f32 %v2833_v17, 0.0  ;;  %v3022_v9 = vrot.slane %v6294_v13, 1 }
  0x73   : > { %4866 = vmatmul.mubr.msk.f32.gmra.mrb[4].mxu1 %vm464_vm2, %v5925_v26  ;;  %v3011_v37 = vrot.slane %v6881_v31, 1  ;;  %v6342_v31 = vld [vmem:[%s6116_s17 + $0x68] sm:$0x3]  ;;  %v3019_v14 = vrot.slane %v6275_v53, 1 }
  0x74   : > { %4868 = vmatprep.mubr.msk.f32.mxu1 %vm464_vm2, %v5928_v52 }
  0x75   : > { %5056 = vmatmul.mubr.msk.f32.vlgmr.msra.gmra.mrb[0].mxu0 %vm464_vm2, %v6242_v25  ;;  %v6353_v18 = vsel %vm439_vm1, %v3010_v8, %v3011_v37  ;;  %v377_v37 = vld [vmem:[%s6860_s0 + $0x54] sm:$0xf]  ;;  %v3023_v8 = vrot.slane %v6890_v22, 1 }
  0x76   : > { %5068 = vmatpush3.msk.msra.mxu0 %vm481_vm0, %v375_v12  ;;  %5058 = vmatprep.mubr.msk.f32.mxu0 %vm464_vm2, %v6249_v10  ;;  %v6288_v12 = vld [vmem:[%s6116_s17 + $0x28] sm:$0x3] }
  0x77   : > { %5081 = vmatprep.subr.msk.mxu0 %vm481_vm0, %v6261_v19  ;;  %4869 = vmatmul.mubr.msk.f32.gmra.mrb[6].mxu1 %vm464_vm2, %v6268_v16  ;;  %v6913_v17 = vmax.f32 %v6288_v12, 0.0 }
  0x78   : > { %4873 = vmatprep.mubr.msk.f32.mxu1 %vm464_vm2, %v6041_v11  ;;  %v363_v11 = vld [vmem:[%s6860_s0 + $0x1c] sm:$0xf] }
  0x79   : > { %5059 = vmatmul.mubr.msk.f32.gmra.mrb[2].mxu0 %vm464_vm2, %v6270_v2  ;;  %v3014_v43 = vrot.slane %v6913_v17, 1 }
  0x7a   : > { %5061 = vmatprep.mubr.msk.f32.mxu0 %vm464_vm2, %v6275_v53 }
  0x7b   : > { %4874 = vmatmul.mubr.msk.f32.vlgmr.msra.gmra.mrb[0].mxu1 %vm464_vm2, %v6054_v24  ;;  %v6360_v54 = vsel %vm439_vm1, %v3013_v32, %v3014_v43  ;;  %v6386_v32 = vsel %vm439_vm1, %v3016_v48, %v3017_v63 }
  0x7c   : > { %4886 = vmatpush3.msk.msra.mxu1 %vm481_vm0, %v362_v60  ;;  %4876 = vmatprep.mubr.msk.f32.mxu1 %vm464_vm2, %v6065_v45  ;;  %v3009_v60 = vsel %vm439_vm1, %v3007_v56, %v3008_v46  ;;  %v1112_v46 = vrot.slane %v6192_v23, 2  ;;  %v6914_v56 = vmax.f32 %v6215_v6, 0.0  ;;  %v6916_v6 = vmax.f32 %v6315_v15, 0.0 }
  0x7d   : > { %5062 = vmatmul.mubr.msk.f32.gmra.mrb[4].mxu0 %vm464_vm2, %v6294_v13  ;;  %4899 = vmatprep.subr.msk.mxu1 %vm481_vm0, %v363_v11 }
  0x7e   : > { %5064 = vmatprep.mubr.msk.f32.mxu0 %vm464_vm2, %v6298_v29  ;;  %v1113_v17 = vrot.slane %v6914_v56, 2  ;;  %v3020_v56 = vrot.slane %v6916_v6, 1  ;;  %v2854_v6 = vmax.f32 %v6367_v55, 0.0  ;;  %v6408_v55 = vsel %vm439_vm1, %v3022_v9, %v3023_v8 }
  0x7f   : > { %4877 = vmatmul.mubr.msk.f32.gmra.mrb[2].mxu1 %vm464_vm2, %v6077_v47 }
  0x80   : > { %4879 = vmatprep.mubr.msk.f32.mxu1 %vm464_vm2, %v6091_v59  ;;  %v6379_v43 = vsel %vm714_vm3, %v1112_v46, %v1113_v17  ;;  %v3025_v46 = vrot.slane %v6298_v29, 1  ;;  %v3029_v48 = vrot.slane %v2854_v6, 1 }
  0x81   : > { %5065 = vmatmul.mubr.msk.f32.gmra.mrb[6].mxu0 %vm464_vm2, %v6320_v61 }
  0x82   : > { %5069 = vmatprep.mubr.msk.f32.mxu0 %vm464_vm2, %v3009_v60  ;;  %v6393_v60 = vsel %vm439_vm1, %v3019_v14, %v3020_v56  ;;  %v3028_v14 = vrot.slane %v6320_v61, 1  ;;  %v3163_v56 = vrot.slane %v6232_v5, 2 }
  0x83   : > { %4880 = vmatmul.mubr.msk.f32.gmra.mrb[4].mxu1 %vm464_vm2, %v6099_v7 }
  0x84   : > { %4882 = vmatprep.mubr.msk.f32.mxu1 %vm464_vm2, %v6123_v39  ;;  %v6430_v5 = vsel %vm439_vm1, %v3028_v14, %v3029_v48 }
  0x85   : > { %5070 = vmatmul.mubr.msk.f32.vlgmr.msra.gmra.mrb[0].mxu0 %vm464_vm2, %v6353_v18 }
  0x86   : > { %5082 = vmatpush3.msk.msra.mxu0 %vm481_vm0, %v6261_v19  ;;  %5072 = vmatprep.mubr.msk.f32.mxu0 %vm464_vm2, %v6360_v54  ;;  %v6917_v19 = vmax.f32 %v6342_v31, 0.0 }
  0x87   : > { %5095 = vmatprep.subr.msk.mxu0 %vm481_vm0, %v377_v37  ;;  %4883 = vmatmul.mubr.msk.f32.gmra.mrb[6].mxu1 %vm464_vm2, %v6379_v43 }
  0x88   : > { %v3026_v17 = vrot.slane %v6917_v19, 1  ;;  %4887 = vmatprep.mubr.msk.f32.mxu1 %vm464_vm2, %v5751_v28  ;;  %v6918_v19 = vmax.f32 %v6256_v35, 0.0  ;;  %v364_v28 = vld [vmem:[%s6860_s0 + $0x20] sm:$0xf]  ;;  %v6919_v35 = vmax.f32 %v6283_v50, 0.0  ;;  %v3172_v50 = vrot.slane %v6270_v2, 2 }
  0x89   : > { %5073 = vmatmul.mubr.msk.f32.gmra.mrb[2].mxu0 %vm464_vm2, %v6386_v32 }
  0x8a   : > { %5075 = vmatprep.mubr.msk.f32.mxu0 %vm464_vm2, %v6393_v60  ;;  %v6412_v63 = vsel %vm439_vm1, %v3025_v46, %v3026_v17  ;;  %v3164_v22 = vrot.slane %v6918_v19, 2  ;;  %v3167_v9 = vrot.slane %v6919_v35, 2  ;;  %v6920_v46 = vmax.f32 %v6288_v12, 0.0 }
  0x8b   : > { %4888 = vmatmul.mubr.msk.f32.vlgmr.msra.gmra.mrb[0].mxu1 %vm464_vm2, %v5772_v40  ;;  %v3166_v40 = vrot.slane %v6242_v25, 2  ;;  %v6921_v12 = vmax.f32 %v6307_v1, 0.0  ;;  %v3178_v1 = vrot.slane %v6294_v13, 2 }
  0x8c   : > { %4900 = vmatpush3.msk.msra.mxu1 %vm481_vm0, %v363_v11  ;;  %4890 = vmatprep.mubr.msk.f32.mxu1 %vm464_vm2, %v5823_v62  ;;  %v3165_v8 = vsel %vm714_vm3, %v3163_v56, %v3164_v22  ;;  %v3169_v11 = vrot.slane %v6249_v10, 2  ;;  %v3170_v17 = vrot.slane %v6920_v46, 2  ;;  %v401_v62 = vld [vmem:[%s5701_s30 + $0x90] sm:$0xff]  ;;  %v6922_v56 = vmax.f32 %v6315_v15, 0.0  ;;  %v402_v46 = vld [vmem:[%s5701_s30 + $0x98] sm:$0x3] }
  0x8d   : > { %5076 = vmatmul.mubr.msk.f32.gmra.mrb[4].mxu0 %vm464_vm2, %v6408_v55  ;;  %4913 = vmatprep.subr.msk.mxu1 %vm481_vm0, %v364_v28  ;;  %v6449_v22 = vsel %vm714_vm3, %v3166_v40, %v3167_v9  ;;  %v3173_v14 = vrot.slane %v6921_v12, 2  ;;  %v378_v40 = vld [vmem:[%s6860_s0 + $0x58] sm:$0xf]  ;;  %v6923_v15 = vmax.f32 %v6337_v58, 0.0  ;;  %v368_v12 = vld [vmem:[%s6860_s0 + $0x30] sm:$0xf] }
  0x8e   : > { %5078 = vmatprep.mubr.msk.f32.mxu0 %vm464_vm2, %v6412_v63  ;;  %v6455_v48 = vsel %vm714_vm3, %v3169_v11, %v3170_v17  ;;  %v3176_v19 = vrot.slane %v6922_v56, 2  ;;  %v3185_v11 = vrot.slane %v2854_v6, 2  ;;  %v6928_v56 = vld [vmem:[#allocation7_spill] sm:$0xff] }
  0x8f   : > { %4891 = vmatmul.mubr.msk.f32.gmra.mrb[2].mxu1 %vm464_vm2, %v5832_v4  ;;  %v3175_v4 = vrot.slane %v6275_v53, 2  ;;  %v3179_v35 = vrot.slane %v6923_v15, 2  ;;  %v6930_v15 = vld [vmem:[#allocation17_spill] sm:$0xff] }
  0x90   : > { %4893 = vmatprep.mubr.msk.f32.mxu1 %vm464_vm2, %v5870_v34  ;;  %v6462_v34 = vmax.f32 %v401_v62, 0.0  ;;  %v422_v62 = vmax.f32 %v402_v46, 0.0  ;;  %v6938_v46 = vld [vmem:[#allocation15_spill] sm:$0xff] }
  0x91   : > { %5079 = vmatmul.mubr.msk.f32.gmra.mrb[6].mxu0 %vm464_vm2, %v6430_v5  ;;  %v6481_v9 = vsel %vm714_vm3, %v3175_v4, %v3176_v19  ;;  %v6496_v58 = vsel %vm714_vm3, %v3178_v1, %v3179_v35  ;;  %v6926_v4 = vld [vmem:[#allocation6_spill] sm:$0xff]  ;;  %v382_v1 = vld [vmem:[%s6860_s0 + $0x68] sm:$0xf] }
  0x92   : > { %5083 = vmatprep.mubr.msk.f32.mxu0 %vm464_vm2, %v3165_v8  ;;  %v3181_v8 = vrot.slane %v6298_v29, 2  ;;  %v6931_v35 = vld [vmem:[#allocation18_spill] sm:$0xff] }
  0x93   : > { %4894 = vmatmul.mubr.msk.f32.gmra.mrb[4].mxu1 %vm464_vm2, %v5878_v36  ;;  %v6475_v36 = vsel %vm714_vm3, %v3172_v50, %v3173_v14  ;;  %v381_v50 = vld [vmem:[%s6860_s0 + $0x64] sm:$0xf] }
  0x94   : > { %4896 = vmatprep.mubr.msk.f32.mxu1 %vm464_vm2, %v6192_v23  ;;  %v6924_v23 = vmax.f32 %v6342_v31, 0.0  ;;  %v3184_v31 = vrot.slane %v6320_v61, 2  ;;  %v6925_v14 = vld [vmem:[#allocation5_spill] sm:$0xff] }
  0x95   : > { %5084 = vmatmul.mubr.msk.f32.vlgmr.msra.gmra.mrb[0].mxu0 %vm464_vm2, %v6449_v22 }
  0x96   : > { %5096 = vmatpush3.msk.msra.mxu0 %vm481_vm0, %v377_v37  ;;  %5086 = vmatprep.mubr.msk.f32.mxu0 %vm464_vm2, %v6455_v48  ;;  %v3182_v37 = vrot.slane %v6924_v23, 2  ;;  %v6516_v6 = vsel %vm714_vm3, %v3184_v31, %v3185_v11  ;;  %v6933_v23 = vld [vmem:[#allocation9_spill] sm:$0xff] }
  0x97   : > { %5109 = vmatprep.subr.msk.mxu0 %vm481_vm0, %v378_v40  ;;  %4897 = vmatmul.mubr.msk.f32.gmra.mrb[6].mxu1 %vm464_vm2, %v6462_v34  ;;  %v6936_v31 = vld [vmem:[#allocation13_spill] sm:$0xff] }
  0x98   : > { %4901 = vmatprep.mubr.msk.f32.mxu1 %vm464_vm2, %v5795_v49  ;;  %v6501_v17 = vsel %vm714_vm3, %v3181_v8, %v3182_v37  ;;  %v365_v49 = vld [vmem:[%s6860_s0 + $0x24] sm:$0xf]  ;;  %v6932_v8 = vld [vmem:[#allocation8_spill] sm:$0xff]  ;;  %v6935_v37 = vld [vmem:[#allocation11_spill] sm:$0xff] }
  0x99   : > { %5087 = vmatmul.mubr.msk.f32.gmra.mrb[2].mxu0 %vm464_vm2, %v6475_v36 }
  0x9a   : > { %5089 = vmatprep.mubr.msk.f32.mxu0 %vm464_vm2, %v6481_v9 }
  0x9b   : > { %4902 = vmatmul.mubr.msk.f32.vlgmr.msra.gmra.mrb[0].mxu1 %vm464_vm2, %v5829_v0  ;;  %v1353_v0 = vrot.slane %v6462_v34, 1 }
  0x9c   : > { %4914 = vmatpush3.msk.msra.mxu1 %vm481_vm0, %v364_v28  ;;  %4904 = vmatprep.mubr.msk.f32.mxu1 %vm464_vm2, %v5865_v30  ;;  %v1354_v30 = vrot.slane %v422_v62, 1  ;;  %v379_v28 = vld [vmem:[%s6860_s0 + $0x5c] sm:$0xf] }
  0x9d   : > { %5090 = vmatmul.mubr.msk.f32.gmra.mrb[4].mxu0 %vm464_vm2, %v6496_v58  ;;  %4927 = vmatprep.subr.msk.mxu1 %vm481_vm0, %v365_v49 }
  0x9e   : > { %5092 = vmatprep.mubr.msk.f32.mxu0 %vm464_vm2, %v6501_v17 }
  0x9f   : > { %4905 = vmatmul.mubr.msk.f32.gmra.mrb[2].mxu1 %vm464_vm2, %v5886_v41  ;;  %v1355_v41 = vsel %vm439_vm1, %v1353_v0, %v1354_v30 }
  0xa0   : > { %4907 = vmatprep.mubr.msk.f32.mxu1 %vm464_vm2, %v5925_v26  ;;  %v366_v26 = vld [vmem:[%s6860_s0 + $0x28] sm:$0xf] }
  0xa1   : > { %5093 = vmatmul.mubr.msk.f32.gmra.mrb[6].mxu0 %vm464_vm2, %v6516_v6 }
  0xa2   : > { %5097 = vmatprep.mubr.msk.f32.mxu0 %vm464_vm2, %v6242_v25 }
  0xa3   : > { %4908 = vmatmul.mubr.msk.f32.gmra.mrb[4].mxu1 %vm464_vm2, %v5928_v52  ;;  %v1474_v52 = vrot.slane %v6462_v34, 2 }
  0xa4   : > { %4910 = vmatprep.mubr.msk.f32.mxu1 %vm464_vm2, %v6268_v16 }
  0xa5   : > { %5098 = vmatmul.mubr.msk.f32.vlgmr.msra.gmra.mrb[0].mxu0 %vm464_vm2, %v6249_v10 }
  0xa6   : > { %5110 = vmatpush3.msk.msra.mxu0 %vm481_vm0, %v378_v40  ;;  %5100 = vmatprep.mubr.msk.f32.mxu0 %vm464_vm2, %v6270_v2  ;;  %v6929_v40 = vld [vmem:[#allocation16_spill] sm:$0xff] }
  0xa7   : > { %5123 = vmatprep.subr.msk.mxu0 %vm481_vm0, %v379_v28  ;;  %4911 = vmatmul.mubr.msk.f32.gmra.mrb[6].mxu1 %vm464_vm2, %v1355_v41 }
  0xa8   : > { %4915 = vmatprep.mubr.msk.f32.mxu1 %vm464_vm2, %v6054_v24  ;;  %v1475_v24 = vrot.slane %v422_v62, 2 }
  0xa9   : > { %5101 = vmatmul.mubr.msk.f32.gmra.mrb[2].mxu0 %vm464_vm2, %v6275_v53 }
  0xaa   : > { %5103 = vmatprep.mubr.msk.f32.mxu0 %vm464_vm2, %v6294_v13 }
  0xab   : > { %4916 = vmatmul.mubr.msk.f32.vlgmr.msra.gmra.mrb[0].mxu1 %vm464_vm2, %v6065_v45  ;;  %v1595_v45 = vld [vmem:[%s5721_s13] sm:$0xff] }
  0xac   : > { %4928 = vmatpush3.msk.msra.mxu1 %vm481_vm0, %v365_v49  ;;  %4918 = vmatprep.mubr.msk.f32.mxu1 %vm464_vm2, %v6077_v47  ;;  %v380_v47 = vld [vmem:[%s6860_s0 + $0x60] sm:$0xf] }
  0xad   : > { %5104 = vmatmul.mubr.msk.f32.gmra.mrb[4].mxu0 %vm464_vm2, %v6298_v29  ;;  %4941 = vmatprep.subr.msk.mxu1 %vm481_vm0, %v366_v26 }
  0xae   : > { %5106 = vmatprep.mubr.msk.f32.mxu0 %vm464_vm2, %v6320_v61 }
  0xaf   : > { %4919 = vmatmul.mubr.msk.f32.gmra.mrb[2].mxu1 %vm464_vm2, %v6091_v59  ;;  %v1476_v59 = vsel %vm714_vm3, %v1474_v52, %v1475_v24 }
  0xb0   : > { %4921 = vmatprep.mubr.msk.f32.mxu1 %vm464_vm2, %v6099_v7  ;;  %v1615_v7 = vmax.f32 %v1595_v45, 0.0 }
  0xb1   : > { %5107 = vmatmul.mubr.msk.f32.gmra.mrb[6].mxu0 %vm464_vm2, %v6145_v21 }
  0xb2   : > { %5111 = vmatprep.mubr.msk.f32.mxu0 %vm464_vm2, %v6353_v18  ;;  %v1596_v18 = vld [vmem:[%s5721_s13 + $0x8] sm:$0x3]  ;;  %v1783_v16 = vrot.slane %v1615_v7, 1  ;;  %v1939_v19 = vrot.slane %v1615_v7, 2 }
  0xb3   : > { %4922 = vmatmul.mubr.msk.f32.gmra.mrb[4].mxu1 %vm464_vm2, %v6123_v39  ;;  %v367_v39 = vld [vmem:[%s6860_s0 + $0x2c] sm:$0xf]  ;;  %v1616_v25 = vmax.f32 %v1596_v18, 0.0 }
  0xb4   : > { %4924 = vmatprep.mubr.msk.f32.mxu1 %vm464_vm2, %v6379_v43 }
  0xb5   : > { %5112 = vmatmul.mubr.msk.f32.vlgmr.msra.gmra.mrb[0].mxu0 %vm464_vm2, %v6360_v54  ;;  %v1784_v43 = vrot.slane %v1616_v25, 1  ;;  %v1940_v34 = vrot.slane %v1616_v25, 2 }
  0xb6   : > { %5124 = vmatpush3.msk.msra.mxu0 %vm481_vm0, %v379_v28  ;;  %5114 = vmatprep.mubr.msk.f32.mxu0 %vm464_vm2, %v6386_v32 }
  0xb7   : > { %5137 = vmatprep.subr.msk.mxu0 %vm481_vm0, %v380_v47  ;;  %4925 = vmatmul.mubr.msk.f32.gmra.mrb[6].mxu1 %vm464_vm2, %v1476_v59 }
  0xb8   : > { %4929 = vmatprep.mubr.msk.f32.mxu1 %vm464_vm2, %v1615_v7 }
  0xb9   : > { %5115 = vmatmul.mubr.msk.f32.gmra.mrb[2].mxu0 %vm464_vm2, %v6393_v60 }
  0xba   : > { %5117 = vmatprep.mubr.msk.f32.mxu0 %vm464_vm2, %v6408_v55 }
  0xbb   : > { %4930 = vmatmul.mubr.msk.f32.vlgmr.msra.gmra.mrb[0].mxu1 %vm464_vm2, %v5737_v20 }
  0xbc   : > { %4942 = vmatpush3.msk.msra.mxu1 %vm481_vm0, %v366_v26  ;;  %4932 = vmatprep.mubr.msk.f32.mxu1 %vm464_vm2, %v5749_v27 }
  0xbd   : > { %5118 = vmatmul.mubr.msk.f32.gmra.mrb[4].mxu0 %vm464_vm2, %v6412_v63  ;;  %4955 = vmatprep.subr.msk.mxu1 %vm481_vm0, %v367_v39 }
  0xbe   : > { %5120 = vmatprep.mubr.msk.f32.mxu0 %vm464_vm2, %v6430_v5 }
  0xbf   : > { %4933 = vmatmul.mubr.msk.f32.gmra.mrb[2].mxu1 %vm464_vm2, %v5798_v51 }
  0xc0   : > { %4935 = vmatprep.mubr.msk.f32.mxu1 %vm464_vm2, %v5814_v57 }
  0xc1   : > { %5121 = vmatmul.mubr.msk.f32.gmra.mrb[6].mxu0 %vm464_vm2, %v6171_v38 }
  0xc2   : > { %5125 = vmatprep.mubr.msk.f32.mxu0 %vm464_vm2, %v6449_v22  ;;  %v1785_v22 = vsel %vm439_vm1, %v1783_v16, %v1784_v43 }
  0xc3   : > { %4936 = vmatmul.mubr.msk.f32.gmra.mrb[4].mxu1 %vm464_vm2, %v5917_v3 }
  0xc4   : > { %4938 = vmatprep.mubr.msk.f32.mxu1 %vm464_vm2, %v5933_v33 }
  0xc5   : > { %5126 = vmatmul.mubr.msk.f32.vlgmr.msra.gmra.mrb[0].mxu0 %vm464_vm2, %v6455_v48 }
  0xc6   : > { %5138 = vmatpush3.msk.msra.mxu0 %vm481_vm0, %v380_v47  ;;  %5128 = vmatprep.mubr.msk.f32.mxu0 %vm464_vm2, %v6475_v36 }
  0xc7   : > { %5151 = vmatprep.subr.msk.mxu0 %vm481_vm0, %v381_v50  ;;  %4939 = vmatmul.mubr.msk.f32.gmra.mrb[6].mxu1 %vm464_vm2, %v5952_v44 }
  0xc8   : > { %4943 = vmatprep.mubr.msk.f32.mxu1 %vm464_vm2, %v1785_v22 }
  0xc9   : > { %5129 = vmatmul.mubr.msk.f32.gmra.mrb[2].mxu0 %vm464_vm2, %v6481_v9 }
  0xca   : > { %5131 = vmatprep.mubr.msk.f32.mxu0 %vm464_vm2, %v6496_v58 }
  0xcb   : > { %4944 = vmatmul.mubr.msk.f32.vlgmr.msra.gmra.mrb[0].mxu1 %vm464_vm2, %v5778_v42  ;;  %v6927_v42 = vld [vmem:[#allocation20_spill] sm:$0xff] }
  0xcc   : > { %4956 = vmatpush3.msk.msra.mxu1 %vm481_vm0, %v367_v39  ;;  %4946 = vmatprep.mubr.msk.f32.mxu1 %vm464_vm2, %v6925_v14 }
  0xcd   : > { %5132 = vmatmul.mubr.msk.f32.gmra.mrb[4].mxu0 %vm464_vm2, %v6501_v17  ;;  %4969 = vmatprep.subr.msk.mxu1 %vm481_vm0, %v368_v12 }
  0xce   : > { %5134 = vmatprep.mubr.msk.f32.mxu0 %vm464_vm2, %v6516_v6 }
  0xcf   : > { %4947 = vmatmul.mubr.msk.f32.gmra.mrb[2].mxu1 %vm464_vm2, %v6926_v4 }
  0xd0   : > { %4949 = vmatprep.mubr.msk.f32.mxu1 %vm464_vm2, %v6928_v56 }
  0xd1   : > { %5135 = vmatmul.mubr.msk.f32.gmra.mrb[6].mxu0 %vm464_vm2, %v6927_v42 }
  0xd2   : > { %5139 = vmatprep.mubr.msk.f32.mxu0 %vm464_vm2, %v6249_v10  ;;  %v1941_v10 = vsel %vm714_vm3, %v1939_v19, %v1940_v34 }
  0xd3   : > { %4950 = vmatmul.mubr.msk.f32.gmra.mrb[4].mxu1 %vm464_vm2, %v6929_v40 }
  0xd4   : > { %4952 = vmatprep.mubr.msk.f32.mxu1 %vm464_vm2, %v6930_v15 }
  0xd5   : > { %5140 = vmatmul.mubr.msk.f32.vlgmr.msra.gmra.mrb[0].mxu0 %vm464_vm2, %v6270_v2  ;;  %v2837_v2 = vld [vmem:[%s6116_s17 + $0x90] sm:$0xff] }
  0xd6   : > { %5152 = vmatpush3.msk.msra.mxu0 %vm481_vm0, %v381_v50  ;;  %5142 = vmatprep.mubr.msk.f32.mxu0 %vm464_vm2, %v6275_v53  ;;  %v2857_v53 = vmax.f32 %v2837_v2, 0.0 }
  0xd7   : > { %5165 = vmatprep.subr.msk.mxu0 %vm481_vm0, %v382_v1  ;;  %4953 = vmatmul.mubr.msk.f32.gmra.mrb[6].mxu1 %vm464_vm2, %v6931_v35 }
  0xd8   : > { %4957 = vmatprep.mubr.msk.f32.mxu1 %vm464_vm2, %v1941_v10 }
  0xd9   : > { %5143 = vmatmul.mubr.msk.f32.gmra.mrb[2].mxu0 %vm464_vm2, %v6294_v13  ;;  %v5464_v13 = vld [vmem:[%s6860_s0 + $0x34] sm:$0xf] }
  0xda   : > { %5145 = vmatprep.mubr.msk.f32.mxu0 %vm464_vm2, %v6298_v29  ;;  %v6934_v29 = vld [vmem:[#allocation10_spill] sm:$0xff] }
  0xdb   : > { %4958 = vmatmul.mubr.msk.f32.vlgmr.msra.gmra.mrb[0].mxu1 %vm464_vm2, %v6932_v8 }
  0xdc   : > { %4970 = vmatpush3.msk.msra.mxu1 %vm481_vm0, %v368_v12  ;;  %4960 = vmatprep.mubr.msk.f32.mxu1 %vm464_vm2, %v6933_v23 }
  0xdd   : > { %5146 = vmatmul.mubr.msk.f32.gmra.mrb[4].mxu0 %vm464_vm2, %v6320_v61  ;;  %5179 = vmatprep.subr.msk.mxu1 %vm481_vm0, %v5464_v13  ;;  %v2838_v61 = vld [vmem:[%s6116_s17 + $0x98] sm:$0x3]  ;;  %s350_s17 = scalar_select %p349_p2, %s5543_s21, 7 }
  0xde   : > { %5148 = vmatprep.mubr.msk.f32.mxu0 %vm464_vm2, %v6145_v21  ;;  %v6937_v21 = vld [vmem:[#allocation14_spill] sm:$0xff]  ;;  %v2858_v11 = vmax.f32 %v2838_v61, 0.0  ;;  %s4116_s21 = scalar_lea.sflag [#allocation3], %s313_s27 }
  0xdf   : > { %4961 = vmatmul.mubr.msk.f32.gmra.mrb[2].mxu1 %vm464_vm2, %v6934_v29  ;;  %s4307_s16 = sshll.u32 %s350_s17, 3  ;;  %s4555_s17 = sshll.u32 %s4130_s15, 5 }
  0xe0   : > { %4963 = vmatprep.mubr.msk.f32.mxu1 %vm464_vm2, %v6935_v37  ;;  %s353_s13 = sadd.s32 %s4308_s8, %s4307_s16  ;;  %s315_s16 = scalar_lea.vmem [#allocation2], %s4303_s12 }
  0xe1   : > { %5149 = vmatmul.mubr.msk.f32.gmra.mrb[6].mxu0 %vm464_vm2, %v2857_v53  ;;  %s4309_s26 = sshll.u32 %s353_s13, 3  ;;  %s4134_s8 = sshll.u32 %s315_s16, 4  ;;  %s6809_s8 = int_to_ptr.vmem [resolvable:$true] %s4134_s8 }
  0xe2   : > { %5153 = vmatprep.mubr.msk.f32.mxu0 %vm464_vm2, %v6360_v54  ;;  %v3801_v54 = vrot.slane %v2857_v53, 1  ;;  %s6767_s10 = scalar_lea.vmem %s6864_s4, %s4309_s26  ;;  %s6807_s30 = scalar_lea.hbm %s6865_s5, %s4555_s17 }
  0xe3   : > { %4964 = vmatmul.mubr.msk.f32.gmra.mrb[4].mxu1 %vm464_vm2, %v6936_v31  ;;  %s5465_s22 = scalar_lea.vmem %s6809_s8, 32 }
  0xe4   : > { %4966 = vmatprep.mubr.msk.f32.mxu1 %vm464_vm2, %v6937_v21  ;;  %p5466_p4 = scmp.ne.s32.totalorder %s6809_s8, %s5465_s22 }
  0xe5   : > { %5154 = vmatmul.mubr.msk.f32.vlgmr.msra.gmra.mrb[0].mxu0 %vm464_vm2, %v6386_v32  ;;  %v3802_v32 = vrot.slane %v2858_v11, 1 }
  0xe6   : > { %5166 = vmatpush3.msk.msra.mxu0 %vm481_vm0, %v382_v1  ;;  %5156 = vmatprep.mubr.msk.f32.mxu0 %vm464_vm2, %v6393_v60  ;;  %p5467_p5 = pnand %p5466_p4, %p5643_p3 }
  0xe7   : > { %4967 = vmatmul.mubr.msk.f32.gmra.mrb[6].mxu1 %vm464_vm2, %v6938_v46 }
  0xe8   : > { %4971 = vmatprep.mubr.msk.f32.mxu1 %vm464_vm2, %v5737_v20  ;;  %v3803_v20 = vsel %vm439_vm1, %v3801_v54, %v3802_v32  ;;  %p5468_p6 = pneg %p5467_p5 }
  0xe9   : > { %5157 = vmatmul.mubr.msk.f32.gmra.mrb[2].mxu0 %vm464_vm2, %v6408_v55 }
  0xea   : > { %5159 = vmatprep.mubr.msk.f32.mxu0 %vm464_vm2, %v6412_v63 }
  0xeb   : > { %4972 = vmatmul.mubr.msk.f32.vlgmr.msra.gmra.mrb[0].mxu1 %vm464_vm2, %v5749_v27  ;;  %v6939_v27 = vld [vmem:[#allocation12_spill] sm:$0xff] }
  0xec   : > { %5180 = vmatpush3.msk.msra.mxu1 %vm481_vm0, %v5464_v13  ;;  %4974 = vmatprep.mubr.msk.f32.mxu1 %vm464_vm2, %v5798_v51  ;;  %v3922_v51 = vrot.slane %v2857_v53, 2 }
  0xed   : > { %5160 = vmatmul.mubr.msk.f32.gmra.mrb[4].mxu0 %vm464_vm2, %v6430_v5 }
  0xee   : > { %5162 = vmatprep.mubr.msk.f32.mxu0 %vm464_vm2, %v6171_v38 }
  0xef   : > { %4975 = vmatmul.mubr.msk.f32.gmra.mrb[2].mxu1 %vm464_vm2, %v5814_v57  ;;  %v3923_v57 = vrot.slane %v2858_v11, 2 }
  0xf0   : > { %4977 = vmatprep.mubr.msk.f32.mxu1 %vm464_vm2, %v5917_v3 }
  0xf1   : > { %5163 = vmatmul.mubr.msk.f32.gmra.mrb[6].mxu0 %vm464_vm2, %v3803_v20  ;;  %v3924_v3 = vsel %vm714_vm3, %v3922_v51, %v3923_v57 }
  0xf2   : > { %5167 = vmatprep.mubr.msk.f32.mxu0 %vm464_vm2, %v6455_v48 }
  0xf3   : > { %4978 = vmatmul.mubr.msk.f32.gmra.mrb[4].mxu1 %vm464_vm2, %v5933_v33  ;;  %v6940_v33 = vld [vmem:[#allocation19_spill] sm:$0xff] }
  0xf4   : > { %4980 = vmatprep.mubr.msk.f32.mxu1 %vm464_vm2, %v5952_v44 }
  0xf5   : > { %5168 = vmatmul.mubr.msk.f32.vlgmr.msra.gmra.mrb[0].mxu0 %vm464_vm2, %v6475_v36 }
  0xf6   : > { %5170 = vmatprep.mubr.msk.f32.mxu0 %vm464_vm2, %v6481_v9 }
  0xf7   : > { %4981 = vmatmul.mubr.msk.f32.gmra.mrb[6].mxu1 %vm464_vm2, %v6939_v27 }
  0xf8   : > { %4991 = vmatprep.mubr.msk.f32.mxu1 %vm464_vm2, %v6929_v40 }
  0xf9   : > { %5171 = vmatmul.mubr.msk.f32.gmra.mrb[2].mxu0 %vm464_vm2, %v6496_v58 }
  0xfa   : > { %5173 = vmatprep.mubr.msk.f32.mxu0 %vm464_vm2, %v6501_v17 }
  0xfb   : > { %4992 = vmatmul.mubr.msk.f32.vlgmr.msra.gmra.mrb[4].mxu1 %vm464_vm2, %v6930_v15 }
  0xfc   : > { %4994 = vmatprep.mubr.msk.f32.mxu1 %vm464_vm2, %v6931_v35 }
  0xfd   : > { %5174 = vmatmul.mubr.msk.f32.gmra.mrb[4].mxu0 %vm464_vm2, %v6516_v6 }
  0xfe   : > { %5176 = vmatprep.mubr.msk.f32.mxu0 %vm464_vm2, %v6927_v42 }
  0xff   : > { %4995 = vmatmul.mubr.msk.f32.gmra.mrb[6].mxu1 %vm464_vm2, %v6940_v33 }
 0x101   : > { %5177 = vmatmul.mubr.msk.f32.gmra.mrb[6].mxu0 %vm464_vm2, %v3924_v3 }
 0x1be   : > { %v4973_v44 = vpop.f32.mrb[0].mxu1 }
 0x1bf   : > { %v2167_v38 = vpop.f32.mrb[1].mxu1 }
 0x1c2   : > { %v4976_v60 = vpop.f32.mrb[2].mxu1 }
 0x1c3   : > { %v2177_v55 = vpop.f32.mrb[3].mxu1 }
 0x1c8   : > { %v5169_v63 = vpop.f32.mrb[0].mxu0 }
 0x1c9   : > { %v5181_v5 = vadd.f32 %v5169_v63, %v4973_v44  ;;  %v3996_v48 = vpop.f32.mrb[1].mxu0 }
 0x1ca   : > { %v5182_v36 = vadd.f32 %v3996_v48, %v2167_v38 }
 0x1cb   : > { %4045 = vst.msk [vmem:[%s6767_s10 + $0x8] sm:$0xff] %vm4043_vm4, %v5181_v5  ;;  %v4053_v9 = vsel %vm4043_vm4, %v5181_v5, 0.0  ;;  %v4074_v58 = vmul.f32 %v5181_v5, %v5181_v5 }
 0x1cc   : > { %4044 = vst.msk [vmem:[%s6767_s10] sm:$0xff] %vm4043_vm4, %v5182_v36  ;;  %v4052_v17 = vsel %vm4043_vm4, %v5182_v36, 0.0  ;;  %v4073_v49 = vmul.f32 %v5182_v36, %v5182_v36  ;;  %v5172_v62 = vpop.f32.mrb[2].mxu0 }
 0x1cd   : > { %v4082_v6 = vsel %vm4043_vm4, %v4074_v58, 0.0  ;;  %v4054_v0 = vadd.f32 %v4053_v9, %v4052_v17  ;;  %v5183_v30 = vadd.f32 %v5172_v62, %v4976_v60  ;;  %v4006_v28 = vpop.f32.mrb[3].mxu0 }
 0x1ce   : > { %v4081_v41 = vsel %vm4043_vm4, %v4073_v49, 0.0  ;;  %v5184_v26 = vadd.f32 %v4006_v28, %v2177_v55  ;;  %v4993_v24 = vpop.f32.mrb[4].mxu1 }
 0x1cf   : > { %v4083_v52 = vadd.f32 %v4082_v6, %v4081_v41  ;;  %4047 = vst.msk [vmem:[%s6767_s10 + $0x18] sm:$0xff] %vm4043_vm4, %v5183_v30  ;;  %v4076_v45 = vmul.f32 %v5183_v30, %v5183_v30  ;;  %v2309_v7 = vpop.f32.mrb[5].mxu1  ;;  %v4057_v43 = vsel %vm4043_vm4, %v5183_v30, 0.0 }
 0x1d0   : > { %4046 = vst.msk [vmem:[%s6767_s10 + $0x10] sm:$0xff] %vm4043_vm4, %v5184_v26  ;;  %v4055_v47 = vsel %vm4043_vm4, %v5184_v26, 0.0  ;;  %v4075_v59 = vmul.f32 %v5184_v26, %v5184_v26  ;;  %v5175_v18 = vpop.f32.mrb[4].mxu0 }
 0x1d1   : > { %v4056_v39 = vadd.f32 %v4055_v47, %v4054_v0  ;;  %v5185_v25 = vadd.f32 %v5175_v18, %v4993_v24  ;;  %v4016_v16 = vpop.f32.mrb[5].mxu0  ;;  %v4086_v42 = vsel %vm4043_vm4, %v4076_v45, 0.0 }
 0x1d2   : > { %v4084_v50 = vsel %vm4043_vm4, %v4075_v59, 0.0  ;;  %v5186_v22 = vadd.f32 %v4016_v16, %v2309_v7  ;;  %v4996_v4 = vpop.f32.mrb[6].mxu1 }
 0x1d3   : > { %v4085_v12 = vadd.f32 %v4084_v50, %v4083_v52  ;;  %4049 = vst.msk [vmem:[%s6767_s10 + $0x28] sm:$0xff] %vm4043_vm4, %v5185_v25  ;;  %v4058_v14 = vadd.f32 %v4057_v43, %v4056_v39  ;;  %v4078_v56 = vmul.f32 %v5185_v25, %v5185_v25  ;;  %v2319_v40 = vpop.f32.mrb[7].mxu1  ;;  %v4061_v8 = vsel %vm4043_vm4, %v5185_v25, 0.0 }
 0x1d4   : > { %4048 = vst.msk [vmem:[%s6767_s10 + $0x20] sm:$0xff] %vm4043_vm4, %v5186_v22  ;;  %v4059_v19 = vsel %vm4043_vm4, %v5186_v22, 0.0  ;;  %v4077_v34 = vmul.f32 %v5186_v22, %v5186_v22  ;;  %v5178_v1 = vpop.f32.mrb[6].mxu0 }
 0x1d5   : > { %v4060_v15 = vadd.f32 %v4059_v19, %v4058_v14  ;;  %v4087_v10 = vadd.f32 %v4086_v42, %v4085_v12  ;;  %v5187_v35 = vadd.f32 %v5178_v1, %v4996_v4  ;;  %v4026_v2 = vpop.f32.mrb[7].mxu0  ;;  %v4090_v37 = vsel %vm4043_vm4, %v4078_v56, 0.0 }
 0x1d6   : > { %v4088_v53 = vsel %vm4043_vm4, %v4077_v34, 0.0  ;;  %v5188_v23 = vadd.f32 %v4026_v2, %v2319_v40 }
 0x1d7   : > { %v4089_v13 = vadd.f32 %v4088_v53, %v4087_v10  ;;  %4051 = vst.msk [vmem:[%s6767_s10 + $0x38] sm:$0xff] %vm4043_vm4, %v5187_v35  ;;  %v4062_v29 = vadd.f32 %v4061_v8, %v4060_v15  ;;  %v4080_v61 = vmul.f32 %v5187_v35, %v5187_v35  ;;  %v4065_v54 = vsel %vm4043_vm4, %v5187_v35, 0.0 }
 0x1d8   : > { %4050 = vst.msk [vmem:[%s6767_s10 + $0x30] sm:$0xff] %vm4043_vm4, %v5188_v23  ;;  %v4063_v31 = vsel %vm4043_vm4, %v5188_v23, 0.0  ;;  %v4079_v21 = vmul.f32 %v5188_v23, %v5188_v23  ;;  %s5469_s10 = sshll.u32 %s5561_s9, 4  ;;  %s5470_s10 = int_to_ptr.vmem [resolvable:$false] %s5469_s10 }
 0x1d9   : > { %v4064_v11 = vadd.f32 %v4063_v31, %v4062_v29  ;;  %v4091_v46 = vadd.f32 %v4090_v37, %v4089_v13  ;;  %v4094_v51 = vsel %vm4043_vm4, %v4080_v61, 0.0  ;;  %s5471_s12 = scalar_lea.vmem %s5470_s10, 64  ;;  %p5472_p7 = scmp.lt.s32.totalorder %s6809_s8, %s5470_s10 }
 0x1da   : > { %v4092_v32 = vsel %vm4043_vm4, %v4079_v21, 0.0  ;;  %p5473_p9 = scmp.lt.s32.totalorder %s5471_s12, %s5465_s22 }
 0x1db   : > { %v4066_v20 = vadd.f32 %v4065_v54, %v4064_v11  ;;  %v4093_v27 = vadd.f32 %v4092_v32, %v4091_v46 }
 0x1dc   : > { %p5474_p10 = por %p5473_p9, %p5472_p7 }
 0x1dd   : > { %v4067_v57 = vrot.slane %v4066_v20, 4  ;;  %v4095_v3 = vadd.f32 %v4094_v51, %v4093_v27 }
 0x1de   : > { %p5475_p11 = pnand %p5474_p10, %p5468_p6 }
 0x1df   : > { %v4068_v33 = vadd.f32 %v4067_v57, %v4066_v20  ;;  %v4096_v44 = vrot.slane %v4095_v3, 4 }
 0x1e1   : > { %v4069_v38 = vrot.slane %v4068_v33, 2  ;;  %v4097_v60 = vadd.f32 %v4096_v44, %v4095_v3 }
 0x1e3   : > { %v4070_v55 = vadd.f32 %v4069_v38, %v4068_v33  ;;  %v4098_v63 = vrot.slane %v4097_v60, 2 }
 0x1e5   : > { %v4071_v5 = vrot.slane %v4070_v55, 1  ;;  %v4099_v48 = vadd.f32 %v4098_v63, %v4097_v60 }
 0x1e7   : > { %v4100_v36 = vrot.slane %v4099_v48, 1  ;;  %v4072_v9 = vadd.f32 %v4071_v5, %v4070_v55 }
 0x1e9   : > { %v4101_v58 = vadd.f32 %v4100_v36, %v4099_v48 }
 0x1eb   : > { %v4103_v17 = vsel %vm4102_vm5, %v4072_v9, %v4101_v58 }
 0x1ec   : > { %4105 = vst.msk [vmem:[%s315_s16] sm:$0x3] %vm4104_vm6, %v4103_v17 }
 0x1ed   : > { %5478 = shalt.err (!%p5475_p11)
}
 0x1ee   : > { %s5479_s27 = scalar_lea.hbm %s6807_s30, 32  ;;  %s5483_s17 = scalar_lea.hbm %s6865_s5, 512 }
 0x1ef   : > { %p5480_p12 = scmp.ne.s32.totalorder %s6807_s30, %s5479_s27  ;;  %p5484_p1 = scmp.lt.u32.totalorder %s6807_s30, %s6865_s5 }
 0x1f0   : > { %p5485_p2 = scmp.lt.u32.totalorder %s5483_s17, %s5479_s27  ;;  %p5487_p5 = scmp.lt.u32.totalorder %s5479_s27, %s6807_s30 }
 0x1f1   : > { %p5481_p13 = pnand %p5480_p12, %p5643_p3 }
 0x1f2   : > { %p5486_p4 = por %p5485_p2, %p5484_p1 }
 0x1f3   : > { %p5482_p0 = pneg %p5481_p13 }
 0x1f4   : > { %p5488_p6 = por %p5487_p5, %p5486_p4 }
 0x1f6   : > { %p5489_p7 = pnand %p5488_p6, %p5482_p0 }
 0x1f8   : > { %5492 = shalt.err (!%p5489_p7)
}
 0x1f9   : > { %5393 = dma.vmem_to_hbm [thread:$0]  (%p5643_p3), %s6809_s8, 32, %s6807_s30, %s4116_s21  }
 0x1fa PF: > { %p5399_p9 = scmp.ge.s32.totalorder %s5559_s25, 2  ;;  %s4158_s26 = sand.u32 1, %s5531_s18  }
 0x1fb   : > { %s4159_s22 = scalar_lea.sflag [#allocation3], %s4158_s26 }
 0x1fc   : > { %p5396_p10 = pnand %p5399_p9, %p5652_p8 }
 0x1fe   : > { %5526 = dma.done.wait (!%p5396_p10), %s4159_s22, 32  }
 0x1ff   : > { %5528 = vsyncadd (!%p5396_p10), %s4159_s22, 4294967264  ;;  %s19_s25 = sadd.s32 1, %s5559_s25   ;;  %s6941_s18 = smov %s5535_s19 }
 0x200   : > { %p16_p11 = scmp.ge.s32.totalorder %s19_s25, 18   ;;  %s6942_s19 = smov %s5539_s20 }
 0x201   : > { %s6943_s20 = smov %s5661_s11  ;;  %s6944_s21 = smov %s5551_s23 }
 0x202   : > { %s6945_s22 = smov %s5555_s24  ;;  %s6946_s23 = smov %s6949_s28 }
 0x203   : > { %s6947_s24 = smov %s6953_s29  ;;  %18 = sbr.rel (!%p16_p11) target bundleno = 5 (0x5), region = 89 }
 0x20a   :  { %4164 = vsyncpa [#allocation3], 1 }
 0x20b   :  { %4166 = vsyncpa [#allocation3 + $0x1], 1 }

</bundles_post_ra>
